<compile_context>
chip_gen: v7x
topology: tpu7x:2x2x1
jax: 0.10.0
libtpu: 0.0.40
codegen_flags: <defaults>
</compile_context>

<pallas_src>
import math

import jax
import jax.numpy as jnp
from jax.experimental import pallas as pl
from jax.experimental.pallas import tpu as pltpu


def _pair(v):
    return (v, v) if isinstance(v, int) else tuple(v)


def _round_up(x, m):
    return ((x + m - 1) // m) * m


def _cdiv(a, b):
    return (a + b - 1) // b


def _make_conv_kernel(*, KH, KW, sh, sw, dh, dw, groups, cinp_p, coutp,
                      tile_oh, OW, Wp, Ct, halo):
    """Builds the per-band conv kernel body."""
    row_span = (tile_oh - 1) * sh + 1     # input rows spanned by one band (per tap)
    col_span = (OW - 1) * sw + 1          # input cols spanned (per tap)

    def kernel(*refs):
        if halo > 0:
            band_ref, halo_ref, w_ref, b_ref, o_ref, acc_ref, patch_ref = refs
        else:
            band_ref, w_ref, b_ref, o_ref, acc_ref, patch_ref = refs
            halo_ref = None

        xb = band_ref[0]                                      # (R, Wp, Ct)
        if halo > 0:
            # Outer-dim concat: band rows + the halo rows of the next band.
            xb = jnp.concatenate([xb, halo_ref[0]], axis=0)   # (R+halo, Wp, Ct)

        # f32 accumulator in VMEM, initialized with the (lane-padded) bias.
        acc_ref[...] = jnp.broadcast_to(
            b_ref[0].astype(jnp.float32), acc_ref.shape)

        for kh in range(KH):
            # All input rows this kernel-row tap needs, decimated by sh.
            rows = jax.lax.slice(
                xb, (kh * dh, 0, 0),
                (kh * dh + row_span, Wp, Ct),
                (sh, 1, 1))                                   # (tile_oh, Wp, Ct)
            for g in range(groups):
                # Fold the KW taps of this group into the contraction dim:
                # patch is (tile_oh, OW, KW * cinp_p).
                for kw in range(KW):
                    patch_ref[:, :, kw * cinp_p:(kw + 1) * cinp_p] = (
                        jax.lax.slice(
                            rows,
                            (0, kw * dw, g * cinp_p),
                            (tile_oh, kw * dw + col_span, (g + 1) * cinp_p),
                            (1, sw, 1)))
                w_kh = w_ref[kh]                              # (KW*cinp_p, TO)
                if groups == 1:
                    acc_ref[...] += jnp.einsum(
                        'hwc,co->hwo', patch_ref[...], w_kh,
                        preferred_element_type=jnp.float32)
                else:
                    acc_ref[:, :, g * coutp:(g + 1) * coutp] += jnp.einsum(
                        'hwc,co->hwo', patch_ref[...],
                        w_kh[:, g * coutp:(g + 1) * coutp],
                        preferred_element_type=jnp.float32)

        o_ref[0] = acc_ref[...].astype(o_ref.dtype)

    return kernel


def conv2d_pallas(x_nchw, weight, bias=None, stride=1, padding=0,
                  dilation=1, groups=1):
    """Vanilla conv2d pdc computed with a tiled Pallas TPU kernel."""
    N, C, H, W = x_nchw.shape
    O, cinp, KH, KW = weight.shape
    sh, sw = _pair(stride)
    ph, pw = _pair(padding)
    dh, dw = _pair(dilation)
    OH = (H + 2 * ph - dh * (KH - 1) - 1) // sh + 1
    OW = (W + 2 * pw - dw * (KW - 1) - 1) // sw + 1
    Hp, Wp = H + 2 * ph, W + 2 * pw
    dtype = x_nchw.dtype
    esize = jnp.dtype(dtype).itemsize

    # ---- channel padding (lane-dense stores / aligned contraction) ---------
    coutp = O // groups
    if groups == 1:
        cinp_p = _round_up(C, 128) if C >= 64 else _round_up(C, 8)
        Ct = cinp_p
    else:
        cinp_p = cinp          # keep per-group channel boundaries intact
        Ct = C
    Op = _round_up(O, 128)     # output lane dim padded to 128
    if groups > 1 or Op <= 512:
        TO = Op
    elif Op % 256 == 0:
        TO = 256
    else:
        TO = 128
    n_o = Op // TO
    k_fold = KW * cinp_p       # folded contraction depth per kh

    # ---- output-row band tiling sized against VMEM -------------------------
    halo = max((KH - 1) * dh + 1 - sh, 0)

    def _vmem_estimate(t):
        r = t * sh
        band = r * Wp * Ct * esize
        halo_b = halo * Wp * Ct * esize
        w_b = KH * k_fold * TO * esize
        out_b = t * OW * TO * esize
        acc_b = t * OW * TO * 4
        patch_b = t * OW * k_fold * esize
        xb_b = (r + halo) * Wp * Ct * esize           # in-kernel concat temp
        return 2 * (band + halo_b + w_b + out_b) + acc_b + patch_b + xb_b

    tile_oh = 1
    for cand in (64, 32, 16, 8, 4, 2, 1):
        t = min(cand, OH)
        if _vmem_estimate(t) <= 20 * 1024 * 1024:
            tile_oh = t
            break
    tile_oh = max(tile_oh, _cdiv(halo, sh), 1)  # halo must fit in one extra band
    T = _cdiv(OH, tile_oh)
    OH_pad = T * tile_oh
    R = tile_oh * sh
    Hp_ext = (T + 1) * R                        # band-aligned padded row count

    # ---- input prep: NCHW -> NHWC, spatial + channel pad, band layout ------
    x = jnp.transpose(x_nchw, (0, 2, 3, 1))                       # (N,H,W,C)
    bot = max(Hp_ext - Hp, 0)
    x = jnp.pad(x, ((0, 0), (ph, ph + bot), (pw, pw), (0, Ct - C)))
    x = x[:, :Hp_ext]                                             # (N,Hp_ext,Wp,Ct)

    inputs = [x]
    in_specs = [pl.BlockSpec((1, R, Wp, Ct), lambda n, t, o: (n, t, 0, 0))]
    if halo > 0:
        xb5 = x.reshape(N, T + 1, R, Wp, Ct)
        halo_arr = xb5[:, 1:, :halo].reshape(N * T, halo, Wp, Ct)
        inputs.append(halo_arr)
        in_specs.append(
            pl.BlockSpec((1, halo, Wp, Ct),
                         lambda n, t, o: (n * T + t, 0, 0, 0)))

    # ---- weight / bias prep: OIHW -> (KH, KW*cinp_p, Op) -------------------
    w = jnp.transpose(weight, (2, 3, 1, 0))                       # (KH,KW,cinp,O)
    w = jnp.pad(w, ((0, 0), (0, 0), (0, cinp_p - cinp), (0, Op - O)))
    w = w.reshape(KH, k_fold, Op).astype(dtype)
    b = bias if bias is not None else jnp.zeros((O,), jnp.float32)
    b = jnp.pad(b.astype(jnp.float32), (0, Op - O)).reshape(1, Op)
    inputs += [w, b]
    in_specs += [
        pl.BlockSpec((KH, k_fold, TO), lambda n, t, o: (0, 0, o)),
        pl.BlockSpec((1, TO), lambda n, t, o: (0, o)),
    ]

    kernel = _make_conv_kernel(
        KH=KH, KW=KW, sh=sh, sw=sw, dh=dh, dw=dw, groups=groups,
        cinp_p=cinp_p, coutp=coutp, tile_oh=tile_oh, OW=OW, Wp=Wp, Ct=Ct,
        halo=halo)

    out_nhwc = pl.pallas_call(
        kernel,
        out_shape=jax.ShapeDtypeStruct((N, OH_pad, OW, Op), dtype),
        grid=(N, T, n_o),
        in_specs=in_specs,
        out_specs=pl.BlockSpec((1, tile_oh, OW, TO),
                               lambda n, t, o: (n, t, 0, o)),
        scratch_shapes=[
            pltpu.VMEM((tile_oh, OW, TO), jnp.float32),   # f32 accumulator
            pltpu.VMEM((tile_oh, OW, k_fold), dtype),     # folded-KW im2col patch
        ],
        compiler_params=pltpu.CompilerParams(
            dimension_semantics=("parallel", "parallel", "parallel"),
            vmem_limit_bytes=48 * 1024 * 1024),
    )(*inputs)

    out = out_nhwc[:, :OH, :, :O]
    return jnp.transpose(out, (0, 3, 1, 2))


class Conv2d:
    """JAX/Pallas equivalent of the PyTorch PiDiNet Conv2d module."""

    def __init__(self, pdc, in_channels, out_channels, kernel_size, stride=1,
                 padding=0, dilation=1, groups=1, bias=False, *, key):
        if in_channels % groups != 0:
            raise ValueError('in_channels must be divisible by groups')
        if out_channels % groups != 0:
            raise ValueError('out_channels must be divisible by groups')
        self.in_channels = in_channels
        self.out_channels = out_channels
        self.kernel_size = kernel_size
        self.stride = stride
        self.padding = padding
        self.dilation = dilation
        self.groups = groups
        self.pdc = pdc

        # Deterministic init mirroring reset_parameters():
        # kaiming_uniform_(a=sqrt(5)) == U(-1/sqrt(fan_in), 1/sqrt(fan_in))
        wkey, bkey = jax.random.split(key)
        fan_in = (in_channels // groups) * kernel_size * kernel_size
        bound = 1.0 / math.sqrt(fan_in)
        self.weight = jax.random.uniform(
            wkey,
            (out_channels, in_channels // groups, kernel_size, kernel_size),
            jnp.float32, -bound, bound)
        self.bias = (jax.random.uniform(bkey, (out_channels,), jnp.float32,
                                        -bound, bound) if bias else None)

    def __call__(self, x):
        return self.pdc(x, self.weight, self.bias, self.stride,
                        self.padding, self.dilation, self.groups)


if __name__ == "__main__":
    key = jax.random.PRNGKey(0)
    xkey, mkey, x2key, m2key = jax.random.split(key, 4)

    # --- primary check: 3x3, stride 1, pad 1, groups 1, no bias -------------
    N, Cin, H, W = 2, 4, 16, 16
    Cout, K = 8, 3
    x = jax.random.normal(xkey, (N, Cin, H, W), jnp.float32)
    conv = Conv2d(conv2d_pallas, Cin, Cout, K, stride=1, padding=1,
                  dilation=1, groups=1, bias=False, key=mkey)
    out = jax.block_until_ready(conv(x))
    ref = jax.lax.conv_general_dilated(
        x, conv.weight, window_strides=(1, 1), padding=((1, 1), (1, 1)),
        rhs_dilation=(1, 1), dimension_numbers=('NCHW', 'OIHW', 'NCHW'),
        feature_group_count=1)
    assert out.shape == (N, Cout, H, W), out.shape
    assert jnp.allclose(out, ref, rtol=1e-5, atol=1e-5), \
        float(jnp.max(jnp.abs(out - ref)))

    # --- secondary check: stride 2, grouped, biased --------------------------
    x2 = jax.random.normal(x2key, (1, 4, 16, 16), jnp.float32)
    conv2 = Conv2d(conv2d_pallas, 4, 8, 3, stride=2, padding=1,
                   dilation=1, groups=2, bias=True, key=m2key)
    out2 = jax.block_until_ready(conv2(x2))
    ref2 = jax.lax.conv_general_dilated(
        x2, conv2.weight, window_strides=(2, 2), padding=((1, 1), (1, 1)),
        rhs_dilation=(1, 1), dimension_numbers=('NCHW', 'OIHW', 'NCHW'),
        feature_group_count=2) + conv2.bias.reshape(1, -1, 1, 1)
    assert out2.shape == (1, 8, 8, 8), out2.shape
    assert jnp.allclose(out2, ref2, rtol=1e-5, atol=1e-5), \
        float(jnp.max(jnp.abs(out2 - ref2)))

    print("KERNEL_OK")
</pallas_src>

<mosaic_0001>
module attributes {stable_mosaic.version = 11 : i64} {
  func.func @kernel(%arg0: i32, %arg1: i32, %arg2: i32, %arg3: memref<1x16x18x8xf32, #tpu.memory_space<vmem>>, %arg4: memref<1x2x18x8xf32, #tpu.memory_space<vmem>>, %arg5: memref<3x24x128xf32, #tpu.memory_space<vmem>>, %arg6: memref<1x128xf32, #tpu.memory_space<vmem>>, %arg7: memref<1x16x16x128xf32, #tpu.memory_space<vmem>>, %arg8: memref<16x16x128xf32, #tpu.memory_space<vmem>>, %arg9: memref<16x16x24xf32, #tpu.memory_space<vmem>>) attributes {dimension_semantics = [#tpu.dimension_semantics<parallel>, #tpu.dimension_semantics<parallel>, #tpu.dimension_semantics<parallel>], iteration_bounds = array<i64: 2, 1, 1>, scalar_prefetch = 0 : i64, scratch_operands = 2 : i64, tpu.core_type = #tpu.core_type<tc>, window_params = [{transform_indices = @transform_0, window_bounds = array<i64: 1, 16, 18, 8>}, {transform_indices = @transform_1, window_bounds = array<i64: 1, 2, 18, 8>}, {transform_indices = @transform_2, window_bounds = array<i64: 3, 24, 128>}, {transform_indices = @transform_3, window_bounds = array<i64: 1, 128>}, {transform_indices = @transform_4, window_bounds = array<i64: 1, 16, 16, 128>}]} {
    %c0 = arith.constant 0 : index
    %c0_0 = arith.constant 0 : index
    %c0_1 = arith.constant 0 : index
    %c0_2 = arith.constant 0 : index
    %0 = vector.load %arg3[%c0, %c0_0, %c0_1, %c0_2] : memref<1x16x18x8xf32, #tpu.memory_space<vmem>>, vector<1x16x18x8xf32>
    %1 = vector.shape_cast %0 : vector<1x16x18x8xf32> to vector<16x18x8xf32>
    %c0_3 = arith.constant 0 : index
    %c0_4 = arith.constant 0 : index
    %c0_5 = arith.constant 0 : index
    %c0_6 = arith.constant 0 : index
    %2 = vector.load %arg4[%c0_3, %c0_4, %c0_5, %c0_6] : memref<1x2x18x8xf32, #tpu.memory_space<vmem>>, vector<1x2x18x8xf32>
    %3 = vector.shape_cast %2 : vector<1x2x18x8xf32> to vector<2x18x8xf32>
    %4 = tpu.concatenate %1, %3 in 0 : vector<16x18x8xf32>, vector<2x18x8xf32> -> vector<18x18x8xf32>
    %c0_7 = arith.constant 0 : index
    %c0_8 = arith.constant 0 : index
    %5 = vector.load %arg6[%c0_7, %c0_8] : memref<1x128xf32, #tpu.memory_space<vmem>>, vector<1x128xf32>
    %6 = vector.shape_cast %5 : vector<1x128xf32> to vector<128xf32>
    %7 = vector.shape_cast %6 : vector<128xf32> to vector<1x1x128xf32>
    %8 = vector.broadcast %7 : vector<1x1x128xf32> to vector<16x16x128xf32>
    %c0_9 = arith.constant 0 : index
    %c0_10 = arith.constant 0 : index
    %c0_11 = arith.constant 0 : index
    %9 = vector.load %arg8[%c0_9, %c0_10, %c0_11] : memref<16x16x128xf32, #tpu.memory_space<vmem>>, vector<16x16x128xf32>
    tpu.vector_store %arg8[%c0_9, %c0_10, %c0_11], %8 {strides = array<i32>} : memref<16x16x128xf32, #tpu.memory_space<vmem>>, vector<16x16x128xf32>,
    %10 = vector.extract_strided_slice %4 {offsets = [0, 0, 0], sizes = [16, 18, 8], strides = [1, 1, 1]} : vector<18x18x8xf32> to vector<16x18x8xf32>
    %11 = vector.extract_strided_slice %10 {offsets = [0, 0, 0], sizes = [16, 16, 8], strides = [1, 1, 1]} : vector<16x18x8xf32> to vector<16x16x8xf32>
    %c0_12 = arith.constant 0 : index
    %c0_13 = arith.constant 0 : index
    %c0_14 = arith.constant 0 : index
    %12 = vector.load %arg9[%c0_12, %c0_13, %c0_14] : memref<16x16x24xf32, #tpu.memory_space<vmem>>, vector<16x16x8xf32>
    tpu.vector_store %arg9[%c0_12, %c0_13, %c0_14], %11 {strides = array<i32>} : memref<16x16x24xf32, #tpu.memory_space<vmem>>, vector<16x16x8xf32>,
    %13 = vector.extract_strided_slice %10 {offsets = [0, 1, 0], sizes = [16, 16, 8], strides = [1, 1, 1]} : vector<16x18x8xf32> to vector<16x16x8xf32>
    %c0_15 = arith.constant 0 : index
    %c0_16 = arith.constant 0 : index
    %c8 = arith.constant 8 : index
    %14 = vector.load %arg9[%c0_15, %c0_16, %c8] : memref<16x16x24xf32, #tpu.memory_space<vmem>>, vector<16x16x8xf32>
    tpu.vector_store %arg9[%c0_15, %c0_16, %c8], %13 {strides = array<i32>} : memref<16x16x24xf32, #tpu.memory_space<vmem>>, vector<16x16x8xf32>,
    %15 = vector.extract_strided_slice %10 {offsets = [0, 2, 0], sizes = [16, 16, 8], strides = [1, 1, 1]} : vector<16x18x8xf32> to vector<16x16x8xf32>
    %c0_17 = arith.constant 0 : index
    %c0_18 = arith.constant 0 : index
    %c16 = arith.constant 16 : index
    %16 = vector.load %arg9[%c0_17, %c0_18, %c16] : memref<16x16x24xf32, #tpu.memory_space<vmem>>, vector<16x16x8xf32>
    tpu.vector_store %arg9[%c0_17, %c0_18, %c16], %15 {strides = array<i32>} : memref<16x16x24xf32, #tpu.memory_space<vmem>>, vector<16x16x8xf32>,
    %c0_19 = arith.constant 0 : index
    %c0_20 = arith.constant 0 : index
    %c0_21 = arith.constant 0 : index
    %17 = vector.load %arg5[%c0_19, %c0_20, %c0_21] : memref<3x24x128xf32, #tpu.memory_space<vmem>>, vector<1x24x128xf32>
    %18 = vector.shape_cast %17 : vector<1x24x128xf32> to vector<24x128xf32>
    %c0_22 = arith.constant 0 : index
    %c0_23 = arith.constant 0 : index
    %c0_24 = arith.constant 0 : index
    %19 = vector.load %arg8[%c0_22, %c0_23, %c0_24] : memref<16x16x128xf32, #tpu.memory_space<vmem>>, vector<16x16x128xf32>
    %c0_25 = arith.constant 0 : index
    %c0_26 = arith.constant 0 : index
    %c0_27 = arith.constant 0 : index
    %20 = vector.load %arg9[%c0_25, %c0_26, %c0_27] : memref<16x16x24xf32, #tpu.memory_space<vmem>>, vector<16x16x24xf32>
    "tpu.trace_start"() <{level = 10 : i32, message = "hwc,co->hwo"}> : () -> ()
    %cst = arith.constant dense<0.000000e+00> : vector<16x16x128xf32>
    %21 = tpu.matmul %20, %18, %cst {dimension_numbers = #tpu.dot_dimension_numbers<[2], [0], [0, 1], [1], [0, 0, 0, 1, 1, 1], [], []>} : vector<16x16x24xf32>, vector<24x128xf32>, vector<16x16x128xf32> -> vector<16x16x128xf32>
    "tpu.trace_stop"() : () -> ()
    %22 = arith.addf %19, %21 : vector<16x16x128xf32>
    %c0_28 = arith.constant 0 : index
    %c0_29 = arith.constant 0 : index
    %c0_30 = arith.constant 0 : index
    %23 = vector.load %arg8[%c0_28, %c0_29, %c0_30] : memref<16x16x128xf32, #tpu.memory_space<vmem>>, vector<16x16x128xf32>
    tpu.vector_store %arg8[%c0_28, %c0_29, %c0_30], %22 {strides = array<i32>} : memref<16x16x128xf32, #tpu.memory_space<vmem>>, vector<16x16x128xf32>,
    %24 = vector.extract_strided_slice %4 {offsets = [1, 0, 0], sizes = [16, 18, 8], strides = [1, 1, 1]} : vector<18x18x8xf32> to vector<16x18x8xf32>
    %25 = vector.extract_strided_slice %24 {offsets = [0, 0, 0], sizes = [16, 16, 8], strides = [1, 1, 1]} : vector<16x18x8xf32> to vector<16x16x8xf32>
    %c0_31 = arith.constant 0 : index
    %c0_32 = arith.constant 0 : index
    %c0_33 = arith.constant 0 : index
    %26 = vector.load %arg9[%c0_31, %c0_32, %c0_33] : memref<16x16x24xf32, #tpu.memory_space<vmem>>, vector<16x16x8xf32>
    tpu.vector_store %arg9[%c0_31, %c0_32, %c0_33], %25 {strides = array<i32>} : memref<16x16x24xf32, #tpu.memory_space<vmem>>, vector<16x16x8xf32>,
    %27 = vector.extract_strided_slice %24 {offsets = [0, 1, 0], sizes = [16, 16, 8], strides = [1, 1, 1]} : vector<16x18x8xf32> to vector<16x16x8xf32>
    %c0_34 = arith.constant 0 : index
    %c0_35 = arith.constant 0 : index
    %c8_36 = arith.constant 8 : index
    %28 = vector.load %arg9[%c0_34, %c0_35, %c8_36] : memref<16x16x24xf32, #tpu.memory_space<vmem>>, vector<16x16x8xf32>
    tpu.vector_store %arg9[%c0_34, %c0_35, %c8_36], %27 {strides = array<i32>} : memref<16x16x24xf32, #tpu.memory_space<vmem>>, vector<16x16x8xf32>,
    %29 = vector.extract_strided_slice %24 {offsets = [0, 2, 0], sizes = [16, 16, 8], strides = [1, 1, 1]} : vector<16x18x8xf32> to vector<16x16x8xf32>
    %c0_37 = arith.constant 0 : index
    %c0_38 = arith.constant 0 : index
    %c16_39 = arith.constant 16 : index
    %30 = vector.load %arg9[%c0_37, %c0_38, %c16_39] : memref<16x16x24xf32, #tpu.memory_space<vmem>>, vector<16x16x8xf32>
    tpu.vector_store %arg9[%c0_37, %c0_38, %c16_39], %29 {strides = array<i32>} : memref<16x16x24xf32, #tpu.memory_space<vmem>>, vector<16x16x8xf32>,
    %c1 = arith.constant 1 : index
    %c0_40 = arith.constant 0 : index
    %c0_41 = arith.constant 0 : index
    %31 = vector.load %arg5[%c1, %c0_40, %c0_41] : memref<3x24x128xf32, #tpu.memory_space<vmem>>, vector<1x24x128xf32>
    %32 = vector.shape_cast %31 : vector<1x24x128xf32> to vector<24x128xf32>
    %c0_42 = arith.constant 0 : index
    %c0_43 = arith.constant 0 : index
    %c0_44 = arith.constant 0 : index
    %33 = vector.load %arg8[%c0_42, %c0_43, %c0_44] : memref<16x16x128xf32, #tpu.memory_space<vmem>>, vector<16x16x128xf32>
    %c0_45 = arith.constant 0 : index
    %c0_46 = arith.constant 0 : index
    %c0_47 = arith.constant 0 : index
    %34 = vector.load %arg9[%c0_45, %c0_46, %c0_47] : memref<16x16x24xf32, #tpu.memory_space<vmem>>, vector<16x16x24xf32>
    "tpu.trace_start"() <{level = 10 : i32, message = "hwc,co->hwo"}> : () -> ()
    %cst_48 = arith.constant dense<0.000000e+00> : vector<16x16x128xf32>
    %35 = tpu.matmul %34, %32, %cst_48 {dimension_numbers = #tpu.dot_dimension_numbers<[2], [0], [0, 1], [1], [0, 0, 0, 1, 1, 1], [], []>} : vector<16x16x24xf32>, vector<24x128xf32>, vector<16x16x128xf32> -> vector<16x16x128xf32>
    "tpu.trace_stop"() : () -> ()
    %36 = arith.addf %33, %35 : vector<16x16x128xf32>
    %c0_49 = arith.constant 0 : index
    %c0_50 = arith.constant 0 : index
    %c0_51 = arith.constant 0 : index
    %37 = vector.load %arg8[%c0_49, %c0_50, %c0_51] : memref<16x16x128xf32, #tpu.memory_space<vmem>>, vector<16x16x128xf32>
    tpu.vector_store %arg8[%c0_49, %c0_50, %c0_51], %36 {strides = array<i32>} : memref<16x16x128xf32, #tpu.memory_space<vmem>>, vector<16x16x128xf32>,
    %38 = vector.extract_strided_slice %4 {offsets = [2, 0, 0], sizes = [16, 18, 8], strides = [1, 1, 1]} : vector<18x18x8xf32> to vector<16x18x8xf32>
    %39 = vector.extract_strided_slice %38 {offsets = [0, 0, 0], sizes = [16, 16, 8], strides = [1, 1, 1]} : vector<16x18x8xf32> to vector<16x16x8xf32>
    %c0_52 = arith.constant 0 : index
    %c0_53 = arith.constant 0 : index
    %c0_54 = arith.constant 0 : index
    %40 = vector.load %arg9[%c0_52, %c0_53, %c0_54] : memref<16x16x24xf32, #tpu.memory_space<vmem>>, vector<16x16x8xf32>
    tpu.vector_store %arg9[%c0_52, %c0_53, %c0_54], %39 {strides = array<i32>} : memref<16x16x24xf32, #tpu.memory_space<vmem>>, vector<16x16x8xf32>,
    %41 = vector.extract_strided_slice %38 {offsets = [0, 1, 0], sizes = [16, 16, 8], strides = [1, 1, 1]} : vector<16x18x8xf32> to vector<16x16x8xf32>
    %c0_55 = arith.constant 0 : index
    %c0_56 = arith.constant 0 : index
    %c8_57 = arith.constant 8 : index
    %42 = vector.load %arg9[%c0_55, %c0_56, %c8_57] : memref<16x16x24xf32, #tpu.memory_space<vmem>>, vector<16x16x8xf32>
    tpu.vector_store %arg9[%c0_55, %c0_56, %c8_57], %41 {strides = array<i32>} : memref<16x16x24xf32, #tpu.memory_space<vmem>>, vector<16x16x8xf32>,
    %43 = vector.extract_strided_slice %38 {offsets = [0, 2, 0], sizes = [16, 16, 8], strides = [1, 1, 1]} : vector<16x18x8xf32> to vector<16x16x8xf32>
    %c0_58 = arith.constant 0 : index
    %c0_59 = arith.constant 0 : index
    %c16_60 = arith.constant 16 : index
    %44 = vector.load %arg9[%c0_58, %c0_59, %c16_60] : memref<16x16x24xf32, #tpu.memory_space<vmem>>, vector<16x16x8xf32>
    tpu.vector_store %arg9[%c0_58, %c0_59, %c16_60], %43 {strides = array<i32>} : memref<16x16x24xf32, #tpu.memory_space<vmem>>, vector<16x16x8xf32>,
    %c2 = arith.constant 2 : index
    %c0_61 = arith.constant 0 : index
    %c0_62 = arith.constant 0 : index
    %45 = vector.load %arg5[%c2, %c0_61, %c0_62] : memref<3x24x128xf32, #tpu.memory_space<vmem>>, vector<1x24x128xf32>
    %46 = vector.shape_cast %45 : vector<1x24x128xf32> to vector<24x128xf32>
    %c0_63 = arith.constant 0 : index
    %c0_64 = arith.constant 0 : index
    %c0_65 = arith.constant 0 : index
    %47 = vector.load %arg8[%c0_63, %c0_64, %c0_65] : memref<16x16x128xf32, #tpu.memory_space<vmem>>, vector<16x16x128xf32>
    %c0_66 = arith.constant 0 : index
    %c0_67 = arith.constant 0 : index
    %c0_68 = arith.constant 0 : index
    %48 = vector.load %arg9[%c0_66, %c0_67, %c0_68] : memref<16x16x24xf32, #tpu.memory_space<vmem>>, vector<16x16x24xf32>
    "tpu.trace_start"() <{level = 10 : i32, message = "hwc,co->hwo"}> : () -> ()
    %cst_69 = arith.constant dense<0.000000e+00> : vector<16x16x128xf32>
    %49 = tpu.matmul %48, %46, %cst_69 {dimension_numbers = #tpu.dot_dimension_numbers<[2], [0], [0, 1], [1], [0, 0, 0, 1, 1, 1], [], []>} : vector<16x16x24xf32>, vector<24x128xf32>, vector<16x16x128xf32> -> vector<16x16x128xf32>
    "tpu.trace_stop"() : () -> ()
    %50 = arith.addf %47, %49 : vector<16x16x128xf32>
    %c0_70 = arith.constant 0 : index
    %c0_71 = arith.constant 0 : index
    %c0_72 = arith.constant 0 : index
    %51 = vector.load %arg8[%c0_70, %c0_71, %c0_72] : memref<16x16x128xf32, #tpu.memory_space<vmem>>, vector<16x16x128xf32>
    tpu.vector_store %arg8[%c0_70, %c0_71, %c0_72], %50 {strides = array<i32>} : memref<16x16x128xf32, #tpu.memory_space<vmem>>, vector<16x16x128xf32>,
    %c0_73 = arith.constant 0 : index
    %c0_74 = arith.constant 0 : index
    %c0_75 = arith.constant 0 : index
    %52 = vector.load %arg8[%c0_73, %c0_74, %c0_75] : memref<16x16x128xf32, #tpu.memory_space<vmem>>, vector<16x16x128xf32>
    %c0_76 = arith.constant 0 : index
    %c0_77 = arith.constant 0 : index
    %c0_78 = arith.constant 0 : index
    %c0_79 = arith.constant 0 : index
    %53 = vector.load %arg7[%c0_76, %c0_77, %c0_78, %c0_79] : memref<1x16x16x128xf32, #tpu.memory_space<vmem>>, vector<1x16x16x128xf32>
    %54 = vector.shape_cast %53 : vector<1x16x16x128xf32> to vector<16x16x128xf32>
    %55 = vector.shape_cast %52 : vector<16x16x128xf32> to vector<1x16x16x128xf32>
    tpu.vector_store %arg7[%c0_76, %c0_77, %c0_78, %c0_79], %55 {strides = array<i32>} : memref<1x16x16x128xf32, #tpu.memory_space<vmem>>, vector<1x16x16x128xf32>,
    return
  }
  func.func @transform_0(%arg0: i32, %arg1: i32, %arg2: i32) -> (i32, i32, i32, i32) {
    %c0_i32 = arith.constant 0 : i32
    %c0_i32_0 = arith.constant 0 : i32
    %c0_i32_1 = arith.constant 0 : i32
    return %arg0, %arg1, %c0_i32, %c0_i32_0 : i32, i32, i32, i32
  }
  func.func @transform_1(%arg0: i32, %arg1: i32, %arg2: i32) -> (i32, i32, i32, i32) {
    %c1_i32 = arith.constant 1 : i32
    %0 = arith.muli %arg0, %c1_i32 : i32
    %1 = arith.addi %0, %arg1 : i32
    %c0_i32 = arith.constant 0 : i32
    %c0_i32_0 = arith.constant 0 : i32
    %c0_i32_1 = arith.constant 0 : i32
    %c0_i32_2 = arith.constant 0 : i32
    return %1, %c0_i32, %c0_i32_0, %c0_i32_1 : i32, i32, i32, i32
  }
  func.func @transform_2(%arg0: i32, %arg1: i32, %arg2: i32) -> (i32, i32, i32) {
    %c0_i32 = arith.constant 0 : i32
    %c0_i32_0 = arith.constant 0 : i32
    %c0_i32_1 = arith.constant 0 : i32
    return %c0_i32, %c0_i32_0, %arg2 : i32, i32, i32
  }
  func.func @transform_3(%arg0: i32, %arg1: i32, %arg2: i32) -> (i32, i32) {
    %c0_i32 = arith.constant 0 : i32
    %c0_i32_0 = arith.constant 0 : i32
    return %c0_i32, %arg2 : i32, i32
  }
  func.func @transform_4(%arg0: i32, %arg1: i32, %arg2: i32) -> (i32, i32, i32, i32) {
    %c0_i32 = arith.constant 0 : i32
    %c0_i32_0 = arith.constant 0 : i32
    return %arg0, %arg1, %c0_i32, %arg2 : i32, i32, i32, i32
  }
}

</mosaic_0001>

<bundles_post_ra>
// kernel: tpu_custom_call.1
= control target key start
LH: loop header
LB: loop body
LE: loop exit
PB: predicated region body
PF: predicated region fallthrough
CT: control target
= control target key end

     0   :  { %9 = vsyncpa [#allocation5], 0  ;;  %s4549_s0 = inlined_call_operand.vmem [shape: f32[2,32,18,8], index: 0, kind: input, shape index: {}]   ;;  %s4550_s1 = inlined_call_operand.vmem [shape: f32[2,2,18,8], index: 1, kind: input, shape index: {}]   ;;  %s4551_s2 = inlined_call_operand.vmem [shape: f32[3,24,128], index: 2, kind: input, shape index: {}]   ;;  %s4552_s3 = inlined_call_operand.vmem [shape: f32[1,128], index: 3, kind: input, shape index: {}]   ;;  %s4553_s4 = inlined_call_operand.hbm [shape: f32[2,16,16,128], index: 4, kind: output, shape index: {}]  }
   0x1   :  { %11 = vsyncpa [#allocation5 + $0x1], 0  ;;  %s3392_s15 = smov 0   ;;  %s3394_s16 = smov 0  }
   0x2   :  { %s3396_s17 = smov 0   ;;  %s3398_s18 = smov 0  }
   0x3   :  { %s3400_s19 = smov 0   ;;  %s3402_s20 = smov 0  }
   0x4 LB: > { %s2725_s21 = sadd.s32 4294967295, %s3361_s20   ;;  %s2726_s22 = sadd.s32 4294967294, %s3361_s20   ;;  %s3361_s20 = sphi %s3402_s20, %s17_s20   ;;  %s3357_s19 = sphi %s3400_s19, %s4560_s19   ;;  %s3353_s18 = sphi %s3398_s18, %s4559_s18   ;;  %s3349_s17 = sphi %s3396_s17, %s4558_s17   ;;  %s3345_s16 = sphi %s3394_s16, %s4557_s16   ;;  %s3341_s15 = sphi %s3392_s15, %s4556_s15  }
   0x5   : > { %s36_s23 = sadd.s32 1, %s3357_s19  ;;  %s155_s24 = sadd.s32 1, %s3349_s17 }
   0x6   : > { %p38_p0 = scmp.ge.s32.totalorder %s36_s23, 2  ;;  %p165_p1 = scmp.ne.s32.totalorder %s3349_s17, %s3345_s16 }
   0x7   : > { %p166_p2 = scmp.eq.s32.totalorder %s2725_s21, 1  ;;  %p171_p3 = scmp.ne.s32.totalorder %s3345_s16, %s3341_s15 }
   0x8   : > { %s4562_s23 = smov (%p38_p0, %s36_s23), 0  ;;  %p172_p5 = scmp.eq.s32.totalorder %s2726_s22, 1 }
   0x9   : > { %p3432_p4 = por %p166_p2, %p165_p1  ;;  %s148_s26 = ssub.s32 %s3357_s19, %s4562_s23 }
   0xa   : > { %p2731_p6 = scmp.ge.s32.totalorder %s3361_s20, 1  ;;  %p153_p7 = scmp.eq.s32.totalorder %s148_s26, 0 }
   0xb   : > { %p3439_p8 = por %p172_p5, %p171_p3  ;;  %p227_p9 = scmp.lt.s32.totalorder %s3361_s20, 3 }
   0xc   : > { %s3445_s28 = scalar_select %p153_p7, %s3349_s17, %s155_s24  }
   0xd   : > { %p228_p10 = pnand %p2731_p6, %p227_p9 }
   0xe   : > { %p272_p11 = scmp.lt.s32.totalorder (!%p228_p10), %s3353_s18, 1  ;;  %v861_v0 = vld [vmem:[%s4551_s2] sm:$0xff] (!%p228_p10)  ;;  %v862_v1 = vld [vmem:[%s4551_s2 + $0x8] sm:$0xff] (!%p228_p10)  ;;  %vm390_vm0 = vcmask (!%p228_p10), 64512   ;;  %s3363_s12 = smov (!%p228_p10), 8   ;;  %v863_v26 = vld [vmem:[%s4551_s2 + $0x10] sm:$0xff] (!%p228_p10) }
   0xf   : > { %231 = sbr.rel (%p228_p10) target bundleno = 662 (0x296), region = 36  ;;  %v3111_v2 = vpack.c.bf16 (!%p228_p10), %v862_v1, %v861_v0  ;;  %s3364_s13 = smov (!%p228_p10), 16   ;;  %v2768_v29 = vld [vmem:[%s4551_s2 + $0x18] sm:$0xff] (!%p228_p10)  ;;  %v2769_v31 = vld [vmem:[%s4551_s2 + $0x20] sm:$0xff] (!%p228_p10)  ;;  %v3603_v33 = vld [vmem:[%s4551_s2 + $0x28] sm:$0xff] (!%p228_p10)  ;;  %vm619_vm1 = vcmask (!%p228_p10), 122944  }
  0x10   : > { %v3598_v32 = vpack.c.bf16 (!%p228_p10), %v2769_v31, %v2768_v29  ;;  %v2803_v49 = vld [vmem:[%s4551_s2 + $0x30] sm:$0xff] (!%p228_p10)  ;;  %v2804_v50 = vld [vmem:[%s4551_s2 + $0x38] sm:$0xff] (!%p228_p10)  ;;  %vm615_vm2 = vcmask (!%p228_p10), 130113   ;;  %vm810_vm3 = vcmask (!%p228_p10), 195714   ;;  %vm617_vm4 = vcmask (!%p228_p10), 130112   ;;  %s2843_s7 = sshll.u32 (!%p228_p10), %s3353_s18, 12 }
  0x11   : > { %3112 = vmatprep.subr.bf16.mxu1 (!%p228_p10), %v3111_v2  ;;  %v3733_v51 = vpack.c.bf16 (!%p228_p10), %v2804_v50, %v2803_v49  ;;  %vm814_vm5 = vcmask (!%p228_p10), 189568   ;;  %vm812_vm6 = vcmask (!%p228_p10), 195712   ;;  %vm928_vm7 = vcmask (!%p228_p10), 195584   ;;  %s4494_s14 = scalar_lea.hbm (!%p228_p10), %s4553_s4, %s2843_s7 }
  0x12   : > { %3114 = vmatpush3.bf16.msra.mxu1 (!%p228_p10), %v3111_v2  ;;  %3116 = vmatprep.subr.bf16.mxu0 (!%p228_p10), %v3598_v32 }
  0x13   : > { %2953 = vmatprep.subr.mxu1 (!%p228_p10), %v863_v26  ;;  %3118 = vmatpush3.bf16.msra.mxu0 (!%p228_p10), %v3598_v32 }
  0x14   : > { %3007 = vmatprep.subr.mxu0 (!%p228_p10), %v3603_v33 }
  0x16   : > { %s3449_s29 = scalar_select %p272_p11, %s3353_s18, 1  ;;  %2954 = vmatpush3.msra.mxu1 %v863_v26 }
  0x17   : > { %3123 = vmatprep.subr.bf16.mxu1 %v3598_v32  ;;  %3008 = vmatpush3.msra.mxu0 %v3603_v33 }
  0x18   : > { %s3223_s8 = smul.u32 768, %s3449_s29  ;;  %3120 = vmatprep.subr.bf16.mxu0 %v3733_v51 }
  0x19   : > { %s3224_s22 = smul.u32 48, %s3449_s29 }
  0x1a   : > { %s3461_s11 = scalar_lea.vmem %s4549_s0, %s3223_s8 }
  0x1b   : > { %v299_v3 = vld [vmem:[%s3461_s11 + $0x10] sm:$0x3]  ;;  %v297_v4 = vld [vmem:[%s3461_s11] sm:$0xff]  ;;  %v298_v5 = vld [vmem:[%s3461_s11 + $0x8] sm:$0xff]  ;;  %s3971_s24 = scalar_lea.vmem %s4550_s1, %s3224_s22  ;;  %s3365_s22 = smov [#allocation4]  }
  0x1c   : > { %475 = vrot.lane.b32.xlu1 %v299_v3, %s3363_s12  ;;  %471 = vrot.lane.b32.xlu0 %v297_v4, %s3363_s12  ;;  %v3469_v6 = vld [vmem:[%s3461_s11 + $0x20] sm:$0xff]  ;;  %v3472_v7 = vld [vmem:[%s3461_s11 + $0x18] sm:$0xff]  ;;  %392 = vst.msk [vmem:[#allocation3 + $0x8] sm:$0xff] %vm390_vm0, %v298_v5  ;;  %391 = vst.msk [vmem:[#allocation3] sm:$0xff] %vm390_vm0, %v297_v4  ;;  %s3287_s29 = sshll.u32 %s3365_s22, 4  ;;  %s3288_s29 = int_to_ptr.vmem [resolvable:$false] %s3287_s29 }
  0x1d   : > { %v3477_v8 = vld [vmem:[%s3461_s11 + $0x38] sm:$0xff]  ;;  %v3480_v9 = vld [vmem:[%s3461_s11 + $0x30] sm:$0xff]  ;;  %393 = vst.msk [vmem:[#allocation3 + $0x10] sm:$0xff] %vm390_vm0, %v3472_v7  ;;  %394 = vst.msk [vmem:[#allocation3 + $0x18] sm:$0xff] %vm390_vm0, %v3469_v6 }
  0x1e   : > { %v3487_v10 = vld [vmem:[%s3461_s11 + $0x50] sm:$0xff]  ;;  %v3490_v11 = vld [vmem:[%s3461_s11 + $0x48] sm:$0xff]  ;;  %395 = vst.msk [vmem:[#allocation3 + $0x20] sm:$0xff] %vm390_vm0, %v3480_v9  ;;  %396 = vst.msk [vmem:[#allocation3 + $0x28] sm:$0xff] %vm390_vm0, %v3477_v8 }
  0x1f   : > { %v3497_v12 = vld [vmem:[%s3461_s11 + $0x68] sm:$0xff]  ;;  %v3500_v13 = vld [vmem:[%s3461_s11 + $0x60] sm:$0xff]  ;;  %397 = vst.msk [vmem:[#allocation3 + $0x30] sm:$0xff] %vm390_vm0, %v3490_v11  ;;  %398 = vst.msk [vmem:[#allocation3 + $0x38] sm:$0xff] %vm390_vm0, %v3487_v10 }
  0x20   : > { %666 = vrot.lane.b32.xlu1 %v297_v4, %s3364_s13  ;;  %473 = vrot.lane.b32.xlu0 %v298_v5, %s3363_s12  ;;  %v3509_v14 = vld [vmem:[%s3461_s11 + $0x80] sm:$0xff]  ;;  %399 = vst.msk [vmem:[#allocation3 + $0x40] sm:$0xff] %vm390_vm0, %v3500_v13  ;;  %400 = vst.msk [vmem:[#allocation3 + $0x48] sm:$0xff] %vm390_vm0, %v3497_v12  ;;  %v3516_v15 = vld [vmem:[%s3461_s11 + $0x78] sm:$0xff] }
  0x21   : > { %v3519_v16 = vld [vmem:[%s3461_s11 + $0x98] sm:$0xff]  ;;  %402 = vst.msk [vmem:[#allocation3 + $0x58] sm:$0xff] %vm390_vm0, %v3509_v14  ;;  %v3524_v17 = vld [vmem:[%s3461_s11 + $0x90] sm:$0xff]  ;;  %401 = vst.msk [vmem:[#allocation3 + $0x50] sm:$0xff] %vm390_vm0, %v3516_v15 }
  0x22   : > { %v3527_v18 = vld [vmem:[%s3461_s11 + $0xb0] sm:$0xff]  ;;  %404 = vst.msk [vmem:[#allocation3 + $0x68] sm:$0xff] %vm390_vm0, %v3519_v16  ;;  %v3534_v19 = vld [vmem:[%s3461_s11 + $0xa8] sm:$0xff]  ;;  %403 = vst.msk [vmem:[#allocation3 + $0x60] sm:$0xff] %vm390_vm0, %v3524_v17 }
  0x23   : > { %v3537_v20 = vld [vmem:[%s3461_s11 + $0xc8] sm:$0xff]  ;;  %406 = vst.msk [vmem:[#allocation3 + $0x78] sm:$0xff] %vm390_vm0, %v3527_v18  ;;  %v3546_v21 = vld [vmem:[%s3461_s11 + $0xc0] sm:$0xff]  ;;  %405 = vst.msk [vmem:[#allocation3 + $0x70] sm:$0xff] %vm390_vm0, %v3534_v19 }
  0x24   : > { %670 = vrot.lane.b32.xlu1 %v299_v3, %s3364_s13  ;;  %668 = vrot.lane.b32.xlu0 %v298_v5, %s3364_s13  ;;  %408 = vst.msk [vmem:[#allocation3 + $0x88] sm:$0xff] %vm390_vm0, %v3537_v20  ;;  %v3553_v22 = vld [vmem:[%s3461_s11 + $0xe0] sm:$0xff]  ;;  %v3556_v23 = vld [vmem:[%s3461_s11 + $0xd8] sm:$0xff]  ;;  %407 = vst.msk [vmem:[#allocation3 + $0x80] sm:$0xff] %vm390_vm0, %v3546_v21 }
  0x25   : > { %409 = vst.msk [vmem:[#allocation3 + $0x90] sm:$0xff] %vm390_vm0, %v3556_v23  ;;  %410 = vst.msk [vmem:[#allocation3 + $0x98] sm:$0xff] %vm390_vm0, %v3553_v22  ;;  %v3565_v24 = vld [vmem:[%s3461_s11 + $0xf8] sm:$0xff]  ;;  %v3568_v25 = vld [vmem:[%s3461_s11 + $0xf0] sm:$0xff] }
  0x26   : > { %412 = vst.msk [vmem:[#allocation3 + $0xa8] sm:$0xff] %vm390_vm0, %v3565_v24  ;;  %411 = vst.msk [vmem:[#allocation3 + $0xa0] sm:$0xff] %vm390_vm0, %v3568_v25  ;;  %v3578_v27 = vld [vmem:[%s3461_s11 + $0x110] sm:$0xff]  ;;  %v3581_v28 = vld [vmem:[%s3461_s11 + $0x108] sm:$0xff] }
  0x27   : > { %414 = vst.msk [vmem:[#allocation3 + $0xb8] sm:$0xff] %vm390_vm0, %v3578_v27  ;;  %413 = vst.msk [vmem:[#allocation3 + $0xb0] sm:$0xff] %vm390_vm0, %v3581_v28  ;;  %v302_v30 = vld [vmem:[%s3461_s11 + $0x28] sm:$0x3]  ;;  %v3612_v35 = vld [vmem:[%s3461_s11 + $0x120] sm:$0xff] }
  0x28   : > { %479 = vrot.lane.b32.xlu1 %v3469_v6, %s3363_s12  ;;  %477 = vrot.lane.b32.xlu0 %v3472_v7, %s3363_s12  ;;  %v3609_v34 = vld [vmem:[%s3461_s11 + $0x128] sm:$0xff]  ;;  %415 = vst.msk [vmem:[#allocation3 + $0xc0] sm:$0xff] %vm390_vm0, %v3612_v35  ;;  %v305_v36 = vld [vmem:[%s3461_s11 + $0x40] sm:$0x3] }
  0x29   : > { %416 = vst.msk [vmem:[#allocation3 + $0xc8] sm:$0xff] %vm390_vm0, %v3609_v34  ;;  %v3635_v37 = vld [vmem:[%s3461_s11 + $0x140] sm:$0xff]  ;;  %v3638_v38 = vld [vmem:[%s3461_s11 + $0x138] sm:$0xff]  ;;  %v3659_v41 = vld [vmem:[%s3461_s11 + $0x150] sm:$0xff] }
  0x2a   : > { %418 = vst.msk [vmem:[#allocation3 + $0xd8] sm:$0xff] %vm390_vm0, %v3635_v37  ;;  %417 = vst.msk [vmem:[#allocation3 + $0xd0] sm:$0xff] %vm390_vm0, %v3638_v38  ;;  %v308_v39 = vld [vmem:[%s3461_s11 + $0x58] sm:$0x3]  ;;  %v311_v42 = vld [vmem:[%s3461_s11 + $0x70] sm:$0x3] }
  0x2b   : > { %v3656_v40 = vld [vmem:[%s3461_s11 + $0x158] sm:$0xff]  ;;  %419 = vst.msk [vmem:[#allocation3 + $0xe0] sm:$0xff] %vm390_vm0, %v3659_v41  ;;  %v3677_v43 = vld [vmem:[%s3461_s11 + $0x170] sm:$0xff]  ;;  %v3680_v44 = vld [vmem:[%s3461_s11 + $0x168] sm:$0xff] }
  0x2c   : > { %672 = vrot.lane.b32.xlu1 %v3472_v7, %s3364_s13  ;;  %481 = vrot.lane.b32.xlu0 %v302_v30, %s3363_s12  ;;  %420 = vst.msk [vmem:[#allocation3 + $0xe8] sm:$0xff] %vm390_vm0, %v3656_v40  ;;  %422 = vst.msk [vmem:[#allocation3 + $0xf8] sm:$0xff] %vm390_vm0, %v3677_v43  ;;  %v314_v45 = vld [vmem:[%s3461_s11 + $0x88] sm:$0x3]  ;;  %v317_v46 = vld [vmem:[%s3461_s11 + $0xa0] sm:$0x3] }
  0x2d   : > { %421 = vst.msk [vmem:[#allocation3 + $0xf0] sm:$0xff] %vm390_vm0, %v3680_v44  ;;  %v320_v47 = vld [vmem:[%s3461_s11 + $0xb8] sm:$0x3]  ;;  %v323_v48 = vld [vmem:[%s3461_s11 + $0xd0] sm:$0x3] }
  0x2e   : > { %v326_v52 = vld [vmem:[%s3461_s11 + $0xe8] sm:$0x3]  ;;  %v329_v57 = vld [vmem:[%s3461_s11 + $0x100] sm:$0x3]  ;;  %v332_v2 = vld [vmem:[%s3461_s11 + $0x118] sm:$0x3] }
  0x30   : > { %676 = vrot.lane.b32.xlu1 %v302_v30, %s3364_s13  ;;  %674 = vrot.lane.b32.xlu0 %v3469_v6, %s3364_s13 }
  0x34   : > { %485 = vrot.lane.b32.xlu1 %v3477_v8, %s3363_s12  ;;  %483 = vrot.lane.b32.xlu0 %v3480_v9, %s3363_s12 }
  0x38   : > { %678 = vrot.lane.b32.xlu1 %v3480_v9, %s3364_s13  ;;  %487 = vrot.lane.b32.xlu0 %v305_v36, %s3363_s12 }
  0x3c   : > { %682 = vrot.lane.b32.xlu1 %v305_v36, %s3364_s13  ;;  %680 = vrot.lane.b32.xlu0 %v3477_v8, %s3364_s13  ;;  %v335_v36 = vld [vmem:[%s3461_s11 + $0x130] sm:$0x3] }
  0x40   : > { %491 = vrot.lane.b32.xlu1 %v3487_v10, %s3363_s12  ;;  %489 = vrot.lane.b32.xlu0 %v3490_v11, %s3363_s12 }
  0x44   : > { %684 = vrot.lane.b32.xlu1 %v3490_v11, %s3364_s13  ;;  %493 = vrot.lane.b32.xlu0 %v308_v39, %s3363_s12 }
  0x48   : > { %688 = vrot.lane.b32.xlu1 %v308_v39, %s3364_s13  ;;  %686 = vrot.lane.b32.xlu0 %v3487_v10, %s3364_s13 }
  0x4c   : > { %497 = vrot.lane.b32.xlu1 %v3497_v12, %s3363_s12  ;;  %495 = vrot.lane.b32.xlu0 %v3500_v13, %s3363_s12 }
  0x50   : > { %690 = vrot.lane.b32.xlu1 %v3500_v13, %s3364_s13  ;;  %499 = vrot.lane.b32.xlu0 %v311_v42, %s3363_s12 }
  0x54   : > { %694 = vrot.lane.b32.xlu1 %v311_v42, %s3364_s13  ;;  %692 = vrot.lane.b32.xlu0 %v3497_v12, %s3364_s13 }
  0x58   : > { %503 = vrot.lane.b32.xlu1 %v3509_v14, %s3363_s12  ;;  %501 = vrot.lane.b32.xlu0 %v3516_v15, %s3363_s12 }
  0x5c   : > { %696 = vrot.lane.b32.xlu1 %v3516_v15, %s3364_s13  ;;  %505 = vrot.lane.b32.xlu0 %v314_v45, %s3363_s12 }
  0x60   : > { %700 = vrot.lane.b32.xlu1 %v314_v45, %s3364_s13  ;;  %698 = vrot.lane.b32.xlu0 %v3509_v14, %s3364_s13 }
  0x64   : > { %509 = vrot.lane.b32.xlu1 %v3519_v16, %s3363_s12  ;;  %507 = vrot.lane.b32.xlu0 %v3524_v17, %s3363_s12 }
  0x68   : > { %702 = vrot.lane.b32.xlu1 %v3524_v17, %s3364_s13  ;;  %511 = vrot.lane.b32.xlu0 %v317_v46, %s3363_s12 }
  0x6c   : > { %706 = vrot.lane.b32.xlu1 %v317_v46, %s3364_s13  ;;  %704 = vrot.lane.b32.xlu0 %v3519_v16, %s3364_s13 }
  0x70   : > { %515 = vrot.lane.b32.xlu1 %v3527_v18, %s3363_s12  ;;  %513 = vrot.lane.b32.xlu0 %v3534_v19, %s3363_s12 }
  0x74   : > { %708 = vrot.lane.b32.xlu1 %v3534_v19, %s3364_s13  ;;  %517 = vrot.lane.b32.xlu0 %v320_v47, %s3363_s12 }
  0x78   : > { %712 = vrot.lane.b32.xlu1 %v320_v47, %s3364_s13  ;;  %710 = vrot.lane.b32.xlu0 %v3527_v18, %s3364_s13 }
  0x7c   : > { %521 = vrot.lane.b32.xlu1 %v3537_v20, %s3363_s12  ;;  %519 = vrot.lane.b32.xlu0 %v3546_v21, %s3363_s12 }
  0x80   : > { %714 = vrot.lane.b32.xlu1 %v3546_v21, %s3364_s13  ;;  %523 = vrot.lane.b32.xlu0 %v323_v48, %s3363_s12 }
  0x84   : > { %718 = vrot.lane.b32.xlu1 %v323_v48, %s3364_s13  ;;  %716 = vrot.lane.b32.xlu0 %v3537_v20, %s3364_s13 }
  0x88   : > { %527 = vrot.lane.b32.xlu1 %v3553_v22, %s3363_s12  ;;  %525 = vrot.lane.b32.xlu0 %v3556_v23, %s3363_s12 }
  0x8c   : > { %720 = vrot.lane.b32.xlu1 %v3556_v23, %s3364_s13  ;;  %529 = vrot.lane.b32.xlu0 %v326_v52, %s3363_s12 }
  0x8e   : > { %v476_v53 = vpop.permute.xlu1 %475  ;;  %v472_v54 = vpop.permute.xlu0 %471 }
  0x8f   : > { %620 = vst.msk [vmem:[#allocation3 + $0xf] sm:$0x1] %vm619_vm1, %v476_v53 }
  0x90   : > { %616 = vst.msk [vmem:[#allocation3 - $0x1] sm:$0xfe] %vm615_vm2, %v472_v54  ;;  %724 = vrot.lane.b32.xlu1 %v326_v52, %s3364_s13  ;;  %722 = vrot.lane.b32.xlu0 %v3553_v22, %s3364_s13 }
  0x92   : > { %v667_v55 = vpop.permute.xlu1 %666  ;;  %v474_v56 = vpop.permute.xlu0 %473 }
  0x93   : > { %811 = vst.msk [vmem:[#allocation3 - $0x2] sm:$0xfc] %vm810_vm3, %v667_v55 }
  0x94   : > { %618 = vst.msk [vmem:[#allocation3 + $0x7] sm:$0xff] %vm617_vm4, %v474_v56  ;;  %533 = vrot.lane.b32.xlu1 %v3565_v24, %s3363_s12  ;;  %531 = vrot.lane.b32.xlu0 %v3568_v25, %s3363_s12 }
  0x96   : > { %v671_v58 = vpop.permute.xlu1 %670  ;;  %v669_v59 = vpop.permute.xlu0 %668 }
  0x97   : > { %815 = vst.msk [vmem:[#allocation3 + $0xe] sm:$0x3] %vm814_vm5, %v671_v58 }
  0x98   : > { %813 = vst.msk [vmem:[#allocation3 + $0x6] sm:$0xff] %vm812_vm6, %v669_v59  ;;  %726 = vrot.lane.b32.xlu1 %v3568_v25, %s3364_s13  ;;  %535 = vrot.lane.b32.xlu0 %v329_v57, %s3363_s12 }
  0x9a   : > { %v480_v60 = vpop.permute.xlu1 %479  ;;  %v478_v61 = vpop.permute.xlu0 %477 }
  0x9b   : > { %622 = vst.msk [vmem:[#allocation3 + $0x17] sm:$0xff] %vm617_vm4, %v480_v60 }
  0x9c   : > { %621 = vst.msk [vmem:[#allocation3 + $0xf] sm:$0xfe] %vm615_vm2, %v478_v61  ;;  %730 = vrot.lane.b32.xlu1 %v329_v57, %s3364_s13  ;;  %728 = vrot.lane.b32.xlu0 %v3565_v24, %s3364_s13 }
  0x9e   : > { %v673_v62 = vpop.permute.xlu1 %672  ;;  %v482_v63 = vpop.permute.xlu0 %481 }
  0x9f   : > { %v897_v0 = vld [vmem:[#allocation3 + $0x8] sm:$0xff]  ;;  %v896_v1 = vld [vmem:[#allocation3] sm:$0xff]  ;;  %816 = vst.msk [vmem:[#allocation3 + $0xe] sm:$0xfc] %vm810_vm3, %v673_v62 }
  0xa0   : > { %623 = vst.msk [vmem:[#allocation3 + $0x1f] sm:$0x1] %vm619_vm1, %v482_v63  ;;  %2955 = vmatprep.mubr.msk.f32.mxu1 %vm928_vm7, %v896_v1  ;;  %539 = vrot.lane.b32.xlu1 %v3578_v27, %s3363_s12 }
  0xa1   : > { %1315 = vst.msk [vmem:[#allocation3 + $0x8] sm:$0xff] %vm390_vm0, %v3469_v6  ;;  %1314 = vst.msk [vmem:[#allocation3] sm:$0xff] %vm390_vm0, %v3472_v7  ;;  %537 = vrot.lane.b32.xlu0 %v3581_v28, %s3363_s12  ;;  %2956 = vmatmul.mubr.msk.f32.vlgmr.msra.gmra.mrb[0].mxu1 %vm928_vm7, %v897_v0 }
  0xa2   : > { %1360 = vst.msk [vmem:[#allocation3 + $0xf] sm:$0x1] %vm619_vm1, %v482_v63  ;;  %v677_v3 = vpop.permute.xlu1 %676  ;;  %v675_v4 = vpop.permute.xlu0 %674  ;;  %3125 = vmatpush3.bf16.msra.mxu1 %v3598_v32 }
  0xa3   : > { %1358 = vst.msk [vmem:[#allocation3 - $0x1] sm:$0xfe] %vm615_vm2, %v478_v61  ;;  %3124 = vmatprep.subr.mxu1 %v3603_v33 }
  0xa4   : > { %1359 = vst.msk [vmem:[#allocation3 + $0x7] sm:$0xff] %vm617_vm4, %v480_v60  ;;  %732 = vrot.lane.b32.xlu1 %v3581_v28, %s3364_s13  ;;  %v341_v60 = vld [vmem:[%s3461_s11 + $0x160] sm:$0x3] }
  0xa5   : > { %1415 = vst.msk [vmem:[#allocation3 - $0x2] sm:$0xfc] %vm810_vm3, %v673_v62  ;;  %541 = vrot.lane.b32.xlu0 %v332_v2, %s3363_s12 }
  0xa6   : > { %818 = vst.msk [vmem:[#allocation3 + $0x1e] sm:$0x3] %vm814_vm5, %v677_v3  ;;  %1417 = vst.msk [vmem:[#allocation3 + $0xe] sm:$0x3] %vm814_vm5, %v677_v3  ;;  %v486_v5 = vpop.permute.xlu1 %485  ;;  %v484_v6 = vpop.permute.xlu0 %483  ;;  %3126 = vmatpush3.msra.mxu1 %v3603_v33 }
  0xa7   : > { %817 = vst.msk [vmem:[#allocation3 + $0x16] sm:$0xff] %vm812_vm6, %v675_v4  ;;  %1416 = vst.msk [vmem:[#allocation3 + $0x6] sm:$0xff] %vm812_vm6, %v675_v4 }
  0xa8   : > { %625 = vst.msk [vmem:[#allocation3 + $0x27] sm:$0xff] %vm617_vm4, %v486_v5  ;;  %736 = vrot.lane.b32.xlu1 %v332_v2, %s3364_s13 }
  0xa9   : > { %624 = vst.msk [vmem:[#allocation3 + $0x1f] sm:$0xfe] %vm615_vm2, %v484_v6  ;;  %734 = vrot.lane.b32.xlu0 %v3578_v27, %s3364_s13 }
  0xaa   : > { %v679_v29 = vpop.permute.xlu1 %678  ;;  %v488_v30 = vpop.permute.xlu0 %487 }
  0xab   : > { %819 = vst.msk [vmem:[#allocation3 + $0x1e] sm:$0xfc] %vm810_vm3, %v679_v29 }
  0xac   : > { %626 = vst.msk [vmem:[#allocation3 + $0x2f] sm:$0x1] %vm619_vm1, %v488_v30  ;;  %545 = vrot.lane.b32.xlu1 %v3609_v34, %s3363_s12 }
  0xad   : > { %543 = vrot.lane.b32.xlu0 %v3612_v35, %s3363_s12 }
  0xae   : > { %v898_v7 = vld [vmem:[#allocation3 + $0x10] sm:$0xff]  ;;  %v899_v26 = vld [vmem:[#allocation3 + $0x18] sm:$0xff]  ;;  %v1500_v31 = vld [vmem:[#allocation3 + $0x8] sm:$0xff]  ;;  %v681_v33 = vpop.permute.xlu0 %680 }
  0xaf   : > { %1316 = vst.msk [vmem:[#allocation3 + $0x10] sm:$0xff] %vm390_vm0, %v3480_v9  ;;  %1317 = vst.msk [vmem:[#allocation3 + $0x18] sm:$0xff] %vm390_vm0, %v3477_v8  ;;  %2958 = vmatprep.mubr.msk.f32.mxu1 %vm928_vm7, %v898_v7  ;;  %v1499_v32 = vld [vmem:[#allocation3] sm:$0xff] }
  0xb0   : > { %1917 = vst.msk [vmem:[#allocation3 + $0x8] sm:$0xff] %vm390_vm0, %v3477_v8  ;;  %3009 = vmatprep.mubr.msk.f32.mxu0 %vm928_vm7, %v1499_v32  ;;  %1916 = vst.msk [vmem:[#allocation3] sm:$0xff] %vm390_vm0, %v3480_v9  ;;  %2959 = vmatmul.mubr.msk.f32.gmra.mrb[2].mxu1 %vm928_vm7, %v899_v26  ;;  %v2805_v8 = vld [vmem:[%s4551_s2 + $0x40] sm:$0xff]  ;;  %v683_v9 = vpop.permute.xlu1 %682 }
  0xb1   : > { %1362 = vst.msk [vmem:[#allocation3 + $0x17] sm:$0xff] %vm617_vm4, %v486_v5  ;;  %1961 = vst.msk [vmem:[#allocation3 + $0x7] sm:$0xff] %vm617_vm4, %v486_v5  ;;  %3010 = vmatmul.mubr.msk.f32.vlgmr.msra.gmra.mrb[0].mxu0 %vm928_vm7, %v1500_v31  ;;  %738 = vrot.lane.b32.xlu1 %v3612_v35, %s3364_s13  ;;  %v344_v5 = vld [vmem:[%s3461_s11 + $0x178] sm:$0x3]  ;;  %v3979_v26 = vld [vmem:[%s3971_s24] sm:$0xff] }
  0xb2   : > { %1361 = vst.msk [vmem:[#allocation3 + $0xf] sm:$0xfe] %vm615_vm2, %v484_v6  ;;  %1960 = vst.msk [vmem:[#allocation3 - $0x1] sm:$0xfe] %vm615_vm2, %v484_v6  ;;  %3122 = vmatpush3.bf16.msra.mxu0 %v3733_v51  ;;  %547 = vrot.lane.b32.xlu0 %v335_v36, %s3363_s12  ;;  %v490_v42 = vpop.permute.xlu0 %489  ;;  %v338_v51 = vld [vmem:[%s3461_s11 + $0x148] sm:$0x3] }
  0xb3   : > { %1363 = vst.msk [vmem:[#allocation3 + $0x1f] sm:$0x1] %vm619_vm1, %v488_v30  ;;  %1962 = vst.msk [vmem:[#allocation3 + $0xf] sm:$0x1] %vm619_vm1, %v488_v30  ;;  %3061 = vmatprep.subr.mxu0 %v2805_v8  ;;  %s3289_s11 = scalar_lea.vmem %s3288_s29, 8192 }
  0xb4   : > { %1418 = vst.msk [vmem:[#allocation3 + $0xe] sm:$0xfc] %vm810_vm3, %v679_v29  ;;  %2017 = vst.msk [vmem:[#allocation3 - $0x2] sm:$0xfc] %vm810_vm3, %v679_v29  ;;  %v492_v39 = vpop.permute.xlu1 %491  ;;  %v3982_v29 = vld [vmem:[%s3971_s24 + $0x8] sm:$0xff] }
  0xb5   : > { %821 = vst.msk [vmem:[#allocation3 + $0x2e] sm:$0x3] %vm814_vm5, %v683_v9  ;;  %1420 = vst.msk [vmem:[#allocation3 + $0x1e] sm:$0x3] %vm814_vm5, %v683_v9  ;;  %742 = vrot.lane.b32.xlu1 %v335_v36, %s3364_s13  ;;  %v347_v36 = vld [vmem:[%s3971_s24 + $0x10] sm:$0x3] }
  0xb6   : > { %2019 = vst.msk [vmem:[#allocation3 + $0xe] sm:$0x3] %vm814_vm5, %v683_v9  ;;  %3062 = vmatpush3.msra.mxu0 %v2805_v8  ;;  %740 = vrot.lane.b32.xlu0 %v3609_v34, %s3364_s13  ;;  %v494_v49 = vpop.permute.xlu0 %493 }
  0xb7   : > { %820 = vst.msk [vmem:[#allocation3 + $0x26] sm:$0xff] %vm812_vm6, %v681_v33  ;;  %1419 = vst.msk [vmem:[#allocation3 + $0x16] sm:$0xff] %vm812_vm6, %v681_v33 }
  0xb8   : > { %2018 = vst.msk [vmem:[#allocation3 + $0x6] sm:$0xff] %vm812_vm6, %v681_v33  ;;  %v685_v48 = vpop.permute.xlu1 %684 }
  0xb9   : > { %628 = vst.msk [vmem:[#allocation3 + $0x37] sm:$0xff] %vm617_vm4, %v492_v39  ;;  %551 = vrot.lane.b32.xlu1 %v3635_v37, %s3363_s12 }
  0xba   : > { %627 = vst.msk [vmem:[#allocation3 + $0x2f] sm:$0xfe] %vm615_vm2, %v490_v42  ;;  %549 = vrot.lane.b32.xlu0 %v3638_v38, %s3363_s12 }
  0xbb   : > { %822 = vst.msk [vmem:[#allocation3 + $0x2e] sm:$0xfc] %vm810_vm3, %v685_v48 }
  0xbc   : > { %629 = vst.msk [vmem:[#allocation3 + $0x3f] sm:$0x1] %vm619_vm1, %v494_v49 }
  0xbd   : > { %744 = vrot.lane.b32.xlu1 %v3638_v38, %s3364_s13 }
  0xbe   : > { %v900_v45 = vld [vmem:[#allocation3 + $0x20] sm:$0xff]  ;;  %v901_v46 = vld [vmem:[#allocation3 + $0x28] sm:$0xff]  ;;  %v1501_v47 = vld [vmem:[#allocation3 + $0x10] sm:$0xff]  ;;  %553 = vrot.lane.b32.xlu0 %v338_v51, %s3363_s12 }
  0xbf   : > { %1318 = vst.msk [vmem:[#allocation3 + $0x20] sm:$0xff] %vm390_vm0, %v3490_v11  ;;  %1319 = vst.msk [vmem:[#allocation3 + $0x28] sm:$0xff] %vm390_vm0, %v3487_v10  ;;  %v1502_v50 = vld [vmem:[#allocation3 + $0x18] sm:$0xff]  ;;  %2961 = vmatprep.mubr.msk.f32.mxu1 %vm928_vm7, %v900_v45  ;;  %3012 = vmatprep.mubr.msk.f32.mxu0 %vm928_vm7, %v1501_v47 }
  0xc0   : > { %1918 = vst.msk [vmem:[#allocation3 + $0x10] sm:$0xff] %vm390_vm0, %v3490_v11  ;;  %1919 = vst.msk [vmem:[#allocation3 + $0x18] sm:$0xff] %vm390_vm0, %v3487_v10  ;;  %2962 = vmatmul.mubr.msk.f32.gmra.mrb[4].mxu1 %vm928_vm7, %v901_v46  ;;  %3013 = vmatmul.mubr.msk.f32.gmra.mrb[2].mxu0 %vm928_vm7, %v1502_v50  ;;  %v689_v10 = vpop.permute.xlu1 %688  ;;  %v687_v11 = vpop.permute.xlu0 %686  ;;  %v4026_v45 = vld [vmem:[%s3971_s24 + $0x18] sm:$0xff]  ;;  %v4029_v46 = vld [vmem:[%s3971_s24 + $0x20] sm:$0xff] }
  0xc1   : > { %1365 = vst.msk [vmem:[#allocation3 + $0x27] sm:$0xff] %vm617_vm4, %v492_v39  ;;  %1964 = vst.msk [vmem:[#allocation3 + $0x17] sm:$0xff] %vm617_vm4, %v492_v39  ;;  %748 = vrot.lane.b32.xlu1 %v338_v51, %s3364_s13  ;;  %v350_v51 = vld [vmem:[%s3971_s24 + $0x28] sm:$0x3] }
  0xc2   : > { %1364 = vst.msk [vmem:[#allocation3 + $0x1f] sm:$0xfe] %vm615_vm2, %v490_v42  ;;  %1963 = vst.msk [vmem:[#allocation3 + $0xf] sm:$0xfe] %vm615_vm2, %v490_v42  ;;  %746 = vrot.lane.b32.xlu0 %v3635_v37, %s3364_s13 }
  0xc3   : > { %1366 = vst.msk [vmem:[#allocation3 + $0x2f] sm:$0x1] %vm619_vm1, %v494_v49  ;;  %1965 = vst.msk [vmem:[#allocation3 + $0x1f] sm:$0x1] %vm619_vm1, %v494_v49 }
  0xc4   : > { %1421 = vst.msk [vmem:[#allocation3 + $0x1e] sm:$0xfc] %vm810_vm3, %v685_v48  ;;  %2020 = vst.msk [vmem:[#allocation3 + $0xe] sm:$0xfc] %vm810_vm3, %v685_v48  ;;  %v498_v52 = vpop.permute.xlu1 %497  ;;  %v496_v53 = vpop.permute.xlu0 %495 }
  0xc5   : > { %824 = vst.msk [vmem:[#allocation3 + $0x3e] sm:$0x3] %vm814_vm5, %v689_v10  ;;  %1423 = vst.msk [vmem:[#allocation3 + $0x2e] sm:$0x3] %vm814_vm5, %v689_v10  ;;  %557 = vrot.lane.b32.xlu1 %v3656_v40, %s3363_s12 }
  0xc6   : > { %2022 = vst.msk [vmem:[#allocation3 + $0x1e] sm:$0x3] %vm814_vm5, %v689_v10  ;;  %555 = vrot.lane.b32.xlu0 %v3659_v41, %s3363_s12 }
  0xc7   : > { %823 = vst.msk [vmem:[#allocation3 + $0x36] sm:$0xff] %vm812_vm6, %v687_v11  ;;  %1422 = vst.msk [vmem:[#allocation3 + $0x26] sm:$0xff] %vm812_vm6, %v687_v11 }
  0xc8   : > { %2021 = vst.msk [vmem:[#allocation3 + $0x16] sm:$0xff] %vm812_vm6, %v687_v11  ;;  %v691_v57 = vpop.permute.xlu1 %690  ;;  %v500_v58 = vpop.permute.xlu0 %499 }
  0xc9   : > { %631 = vst.msk [vmem:[#allocation3 + $0x47] sm:$0xff] %vm617_vm4, %v498_v52  ;;  %750 = vrot.lane.b32.xlu1 %v3659_v41, %s3364_s13 }
  0xca   : > { %630 = vst.msk [vmem:[#allocation3 + $0x3f] sm:$0xfe] %vm615_vm2, %v496_v53  ;;  %559 = vrot.lane.b32.xlu0 %v341_v60, %s3363_s12 }
  0xcb   : > { %825 = vst.msk [vmem:[#allocation3 + $0x3e] sm:$0xfc] %vm810_vm3, %v691_v57 }
  0xcc   : > { %632 = vst.msk [vmem:[#allocation3 + $0x4f] sm:$0x1] %vm619_vm1, %v500_v58 }
  0xcd   : > { %754 = vrot.lane.b32.xlu1 %v341_v60, %s3364_s13 }
  0xce   : > { %v902_v54 = vld [vmem:[#allocation3 + $0x30] sm:$0xff]  ;;  %v903_v55 = vld [vmem:[#allocation3 + $0x38] sm:$0xff]  ;;  %v1503_v56 = vld [vmem:[#allocation3 + $0x20] sm:$0xff]  ;;  %752 = vrot.lane.b32.xlu0 %v3656_v40, %s3364_s13 }
  0xcf   : > { %1320 = vst.msk [vmem:[#allocation3 + $0x30] sm:$0xff] %vm390_vm0, %v3500_v13  ;;  %1321 = vst.msk [vmem:[#allocation3 + $0x38] sm:$0xff] %vm390_vm0, %v3497_v12  ;;  %v1504_v59 = vld [vmem:[#allocation3 + $0x28] sm:$0xff]  ;;  %2964 = vmatprep.mubr.msk.f32.mxu1 %vm928_vm7, %v902_v54  ;;  %3015 = vmatprep.mubr.msk.f32.mxu0 %vm928_vm7, %v1503_v56 }
  0xd0   : > { %1920 = vst.msk [vmem:[#allocation3 + $0x20] sm:$0xff] %vm390_vm0, %v3500_v13  ;;  %1921 = vst.msk [vmem:[#allocation3 + $0x28] sm:$0xff] %vm390_vm0, %v3497_v12  ;;  %2965 = vmatmul.mubr.msk.f32.gmra.mrb[6].mxu1 %vm928_vm7, %v903_v55  ;;  %3016 = vmatmul.mubr.msk.f32.gmra.mrb[4].mxu0 %vm928_vm7, %v1504_v59  ;;  %v695_v12 = vpop.permute.xlu1 %694  ;;  %v693_v13 = vpop.permute.xlu0 %692 }
  0xd1   : > { %1368 = vst.msk [vmem:[#allocation3 + $0x37] sm:$0xff] %vm617_vm4, %v498_v52  ;;  %1967 = vst.msk [vmem:[#allocation3 + $0x27] sm:$0xff] %vm617_vm4, %v498_v52  ;;  %563 = vrot.lane.b32.xlu1 %v3677_v43, %s3363_s12 }
  0xd2   : > { %1367 = vst.msk [vmem:[#allocation3 + $0x2f] sm:$0xfe] %vm615_vm2, %v496_v53  ;;  %1966 = vst.msk [vmem:[#allocation3 + $0x1f] sm:$0xfe] %vm615_vm2, %v496_v53  ;;  %561 = vrot.lane.b32.xlu0 %v3680_v44, %s3363_s12 }
  0xd3   : > { %1369 = vst.msk [vmem:[#allocation3 + $0x3f] sm:$0x1] %vm619_vm1, %v500_v58  ;;  %1968 = vst.msk [vmem:[#allocation3 + $0x2f] sm:$0x1] %vm619_vm1, %v500_v58 }
  0xd4   : > { %1424 = vst.msk [vmem:[#allocation3 + $0x2e] sm:$0xfc] %vm810_vm3, %v691_v57  ;;  %2023 = vst.msk [vmem:[#allocation3 + $0x1e] sm:$0xfc] %vm810_vm3, %v691_v57  ;;  %v504_v61 = vpop.permute.xlu1 %503  ;;  %v502_v62 = vpop.permute.xlu0 %501 }
  0xd5   : > { %827 = vst.msk [vmem:[#allocation3 + $0x4e] sm:$0x3] %vm814_vm5, %v695_v12  ;;  %1426 = vst.msk [vmem:[#allocation3 + $0x3e] sm:$0x3] %vm814_vm5, %v695_v12  ;;  %756 = vrot.lane.b32.xlu1 %v3680_v44, %s3364_s13 }
  0xd6   : > { %2025 = vst.msk [vmem:[#allocation3 + $0x2e] sm:$0x3] %vm814_vm5, %v695_v12  ;;  %565 = vrot.lane.b32.xlu0 %v344_v5, %s3363_s12 }
  0xd7   : > { %826 = vst.msk [vmem:[#allocation3 + $0x46] sm:$0xff] %vm812_vm6, %v693_v13  ;;  %1425 = vst.msk [vmem:[#allocation3 + $0x36] sm:$0xff] %vm812_vm6, %v693_v13 }
  0xd8   : > { %2024 = vst.msk [vmem:[#allocation3 + $0x26] sm:$0xff] %vm812_vm6, %v693_v13  ;;  %v697_v2 = vpop.permute.xlu1 %696  ;;  %v506_v3 = vpop.permute.xlu0 %505 }
  0xd9   : > { %634 = vst.msk [vmem:[#allocation3 + $0x57] sm:$0xff] %vm617_vm4, %v504_v61  ;;  %760 = vrot.lane.b32.xlu1 %v344_v5, %s3364_s13  ;;  %v2104_v5 = vld [vmem:[#allocation3 + $0x18] sm:$0xff] }
  0xda   : > { %633 = vst.msk [vmem:[#allocation3 + $0x4f] sm:$0xfe] %vm615_vm2, %v502_v62  ;;  %758 = vrot.lane.b32.xlu0 %v3677_v43, %s3364_s13 }
  0xdb   : > { %828 = vst.msk [vmem:[#allocation3 + $0x4e] sm:$0xfc] %vm810_vm3, %v697_v2 }
  0xdc   : > { %635 = vst.msk [vmem:[#allocation3 + $0x5f] sm:$0x1] %vm619_vm1, %v506_v3 }
  0xdd   : > { %1351 = vrot.lane.b32.xlu1 %v3982_v29, %s3363_s12 }
  0xde   : > { %v904_v63 = vld [vmem:[#allocation3 + $0x40] sm:$0xff]  ;;  %v905_v0 = vld [vmem:[#allocation3 + $0x48] sm:$0xff]  ;;  %v1505_v1 = vld [vmem:[#allocation3 + $0x30] sm:$0xff]  ;;  %1349 = vrot.lane.b32.xlu0 %v3979_v26, %s3363_s12 }
  0xdf   : > { %1322 = vst.msk [vmem:[#allocation3 + $0x40] sm:$0xff] %vm390_vm0, %v3516_v15  ;;  %1323 = vst.msk [vmem:[#allocation3 + $0x48] sm:$0xff] %vm390_vm0, %v3509_v14  ;;  %v1506_v4 = vld [vmem:[#allocation3 + $0x38] sm:$0xff]  ;;  %2967 = vmatprep.mubr.msk.f32.mxu1 %vm928_vm7, %v904_v63  ;;  %3018 = vmatprep.mubr.msk.f32.mxu0 %vm928_vm7, %v1505_v1 }
  0xe0   : > { %1922 = vst.msk [vmem:[#allocation3 + $0x30] sm:$0xff] %vm390_vm0, %v3516_v15  ;;  %1923 = vst.msk [vmem:[#allocation3 + $0x38] sm:$0xff] %vm390_vm0, %v3509_v14  ;;  %2968 = vmatmul.mubr.msk.f32.gmra.mrb[8].mxu1 %vm928_vm7, %v905_v0  ;;  %3019 = vmatmul.mubr.msk.f32.gmra.mrb[6].mxu0 %vm928_vm7, %v1506_v4  ;;  %v701_v14 = vpop.permute.xlu1 %700  ;;  %v699_v15 = vpop.permute.xlu0 %698  ;;  %v2103_v4 = vld [vmem:[#allocation3 + $0x10] sm:$0xff] }
  0xe1   : > { %1371 = vst.msk [vmem:[#allocation3 + $0x47] sm:$0xff] %vm617_vm4, %v504_v61  ;;  %1970 = vst.msk [vmem:[#allocation3 + $0x37] sm:$0xff] %vm617_vm4, %v504_v61  ;;  %1406 = vrot.lane.b32.xlu1 %v3979_v26, %s3364_s13 }
  0xe2   : > { %1370 = vst.msk [vmem:[#allocation3 + $0x3f] sm:$0xfe] %vm615_vm2, %v502_v62  ;;  %1969 = vst.msk [vmem:[#allocation3 + $0x2f] sm:$0xfe] %vm615_vm2, %v502_v62  ;;  %1353 = vrot.lane.b32.xlu0 %v347_v36, %s3363_s12 }
  0xe3   : > { %1372 = vst.msk [vmem:[#allocation3 + $0x4f] sm:$0x1] %vm619_vm1, %v506_v3  ;;  %1971 = vst.msk [vmem:[#allocation3 + $0x3f] sm:$0x1] %vm619_vm1, %v506_v3  ;;  %v2102_v3 = vld [vmem:[#allocation3 + $0x8] sm:$0xff] }
  0xe4   : > { %1427 = vst.msk [vmem:[#allocation3 + $0x3e] sm:$0xfc] %vm810_vm3, %v697_v2  ;;  %2026 = vst.msk [vmem:[#allocation3 + $0x2e] sm:$0xfc] %vm810_vm3, %v697_v2  ;;  %v510_v6 = vpop.permute.xlu1 %509  ;;  %v508_v7 = vpop.permute.xlu0 %507 }
  0xe5   : > { %830 = vst.msk [vmem:[#allocation3 + $0x5e] sm:$0x3] %vm814_vm5, %v701_v14  ;;  %1429 = vst.msk [vmem:[#allocation3 + $0x4e] sm:$0x3] %vm814_vm5, %v701_v14  ;;  %1410 = vrot.lane.b32.xlu1 %v347_v36, %s3364_s13 }
  0xe6   : > { %2028 = vst.msk [vmem:[#allocation3 + $0x3e] sm:$0x3] %vm814_vm5, %v701_v14  ;;  %1408 = vrot.lane.b32.xlu0 %v3982_v29, %s3364_s13 }
  0xe7   : > { %829 = vst.msk [vmem:[#allocation3 + $0x56] sm:$0xff] %vm812_vm6, %v699_v15  ;;  %1428 = vst.msk [vmem:[#allocation3 + $0x46] sm:$0xff] %vm812_vm6, %v699_v15 }
  0xe8   : > { %2027 = vst.msk [vmem:[#allocation3 + $0x36] sm:$0xff] %vm812_vm6, %v699_v15  ;;  %v703_v8 = vpop.permute.xlu1 %702  ;;  %v512_v9 = vpop.permute.xlu0 %511 }
  0xe9   : > { %637 = vst.msk [vmem:[#allocation3 + $0x67] sm:$0xff] %vm617_vm4, %v510_v6  ;;  %1953 = vrot.lane.b32.xlu1 %v4029_v46, %s3363_s12 }
  0xea   : > { %636 = vst.msk [vmem:[#allocation3 + $0x5f] sm:$0xfe] %vm615_vm2, %v508_v7  ;;  %1951 = vrot.lane.b32.xlu0 %v4026_v45, %s3363_s12 }
  0xeb   : > { %831 = vst.msk [vmem:[#allocation3 + $0x5e] sm:$0xfc] %vm810_vm3, %v703_v8 }
  0xec   : > { %638 = vst.msk [vmem:[#allocation3 + $0x6f] sm:$0x1] %vm619_vm1, %v512_v9 }
  0xed   : > { %2008 = vrot.lane.b32.xlu1 %v4026_v45, %s3364_s13 }
  0xee   : > { %v906_v30 = vld [vmem:[#allocation3 + $0x50] sm:$0xff]  ;;  %v907_v31 = vld [vmem:[#allocation3 + $0x58] sm:$0xff]  ;;  %v1507_v32 = vld [vmem:[#allocation3 + $0x40] sm:$0xff]  ;;  %1955 = vrot.lane.b32.xlu0 %v350_v51, %s3363_s12 }
  0xef   : > { %1324 = vst.msk [vmem:[#allocation3 + $0x50] sm:$0xff] %vm390_vm0, %v3524_v17  ;;  %1325 = vst.msk [vmem:[#allocation3 + $0x58] sm:$0xff] %vm390_vm0, %v3519_v16  ;;  %v1508_v33 = vld [vmem:[#allocation3 + $0x48] sm:$0xff]  ;;  %2970 = vmatprep.mubr.msk.f32.mxu1 %vm928_vm7, %v906_v30  ;;  %3021 = vmatprep.mubr.msk.f32.mxu0 %vm928_vm7, %v1507_v32 }
  0xf0   : > { %1924 = vst.msk [vmem:[#allocation3 + $0x40] sm:$0xff] %vm390_vm0, %v3524_v17  ;;  %1925 = vst.msk [vmem:[#allocation3 + $0x48] sm:$0xff] %vm390_vm0, %v3519_v16  ;;  %2971 = vmatmul.mubr.msk.f32.gmra.mrb[10].mxu1 %vm928_vm7, %v907_v31  ;;  %3022 = vmatmul.mubr.msk.f32.gmra.mrb[8].mxu0 %vm928_vm7, %v1508_v33  ;;  %v707_v16 = vpop.permute.xlu1 %706  ;;  %v705_v17 = vpop.permute.xlu0 %704  ;;  %v2106_v33 = vld [vmem:[#allocation3 + $0x28] sm:$0xff] }
  0xf1   : > { %1374 = vst.msk [vmem:[#allocation3 + $0x57] sm:$0xff] %vm617_vm4, %v510_v6  ;;  %1973 = vst.msk [vmem:[#allocation3 + $0x47] sm:$0xff] %vm617_vm4, %v510_v6  ;;  %2012 = vrot.lane.b32.xlu1 %v350_v51, %s3364_s13  ;;  %v2105_v6 = vld [vmem:[#allocation3 + $0x20] sm:$0xff] }
  0xf2   : > { %1373 = vst.msk [vmem:[#allocation3 + $0x4f] sm:$0xfe] %vm615_vm2, %v508_v7  ;;  %1972 = vst.msk [vmem:[#allocation3 + $0x3f] sm:$0xfe] %vm615_vm2, %v508_v7  ;;  %2010 = vrot.lane.b32.xlu0 %v4029_v46, %s3364_s13  ;;  %s268_s13 = sand.u32 1, %s3345_s16  }
  0xf3   : > { %1375 = vst.msk [vmem:[#allocation3 + $0x5f] sm:$0x1] %vm619_vm1, %v512_v9  ;;  %1974 = vst.msk [vmem:[#allocation3 + $0x4f] sm:$0x1] %vm619_vm1, %v512_v9  ;;  %s2732_s5 = sshll.u32 %s268_s13, 8  ;;  %s4502_s18 = scalar_lea.sflag [#allocation5], %s268_s13 }
  0xf4   : > { %1430 = vst.msk [vmem:[#allocation3 + $0x4e] sm:$0xfc] %vm810_vm3, %v703_v8  ;;  %2029 = vst.msk [vmem:[#allocation3 + $0x3e] sm:$0xfc] %vm810_vm3, %v703_v8  ;;  %v516_v39 = vpop.permute.xlu1 %515  ;;  %v514_v42 = vpop.permute.xlu0 %513  ;;  %s4428_s6 = scalar_lea.vmem [#allocation4], %s2732_s5 }
  0xf5   : > { %833 = vst.msk [vmem:[#allocation3 + $0x6e] sm:$0x3] %vm814_vm5, %v707_v16  ;;  %1432 = vst.msk [vmem:[#allocation3 + $0x5e] sm:$0x3] %vm814_vm5, %v707_v16  ;;  %s2600_s8 = sshll.u32 %s4428_s6, 4  ;;  %s4496_s8 = int_to_ptr.vmem [resolvable:$true] %s2600_s8 }
  0xf6   : > { %2031 = vst.msk [vmem:[#allocation3 + $0x4e] sm:$0x3] %vm814_vm5, %v707_v16  ;;  %s3283_s21 = scalar_lea.vmem %s4496_s8, 4096  ;;  %p3290_p1 = scmp.lt.s32.totalorder %s4496_s8, %s3288_s29 }
  0xf7   : > { %832 = vst.msk [vmem:[#allocation3 + $0x66] sm:$0xff] %vm812_vm6, %v705_v17  ;;  %1431 = vst.msk [vmem:[#allocation3 + $0x56] sm:$0xff] %vm812_vm6, %v705_v17  ;;  %p3284_p12 = scmp.ne.s32.totalorder %s4496_s8, %s3283_s21  ;;  %p3291_p2 = scmp.lt.s32.totalorder %s3289_s11, %s3283_s21 }
  0xf8   : > { %2030 = vst.msk [vmem:[#allocation3 + $0x46] sm:$0xff] %vm812_vm6, %v705_v17  ;;  %v709_v50 = vpop.permute.xlu1 %708  ;;  %v518_v10 = vpop.permute.xlu0 %517  ;;  %v2108_v17 = vld [vmem:[#allocation3 + $0x38] sm:$0xff] }
  0xf9   : > { %640 = vst.msk [vmem:[#allocation3 + $0x77] sm:$0xff] %vm617_vm4, %v516_v39  ;;  %p3285_p13 = pnand %p3284_p12, %p3432_p4  ;;  %p3292_p3 = por %p3291_p2, %p3290_p1 }
  0xfa   : > { %639 = vst.msk [vmem:[#allocation3 + $0x6f] sm:$0xfe] %vm615_vm2, %v514_v42 }
  0xfb   : > { %834 = vst.msk [vmem:[#allocation3 + $0x6e] sm:$0xfc] %vm810_vm3, %v709_v50  ;;  %p3286_p0 = pneg %p3285_p13 }
  0xfc   : > { %641 = vst.msk [vmem:[#allocation3 + $0x7f] sm:$0x1] %vm619_vm1, %v518_v10 }
  0xfd   : > { %p3293_p5 = pnand %p3292_p3, %p3286_p0 }
  0xfe   : > { %v908_v47 = vld [vmem:[#allocation3 + $0x60] sm:$0xff]  ;;  %v909_v48 = vld [vmem:[#allocation3 + $0x68] sm:$0xff]  ;;  %v1509_v49 = vld [vmem:[#allocation3 + $0x50] sm:$0xff] }
  0xff   : > { %1326 = vst.msk [vmem:[#allocation3 + $0x60] sm:$0xff] %vm390_vm0, %v3534_v19  ;;  %1327 = vst.msk [vmem:[#allocation3 + $0x68] sm:$0xff] %vm390_vm0, %v3527_v18  ;;  %v1510_v11 = vld [vmem:[#allocation3 + $0x58] sm:$0xff]  ;;  %2973 = vmatprep.mubr.msk.f32.mxu1 %vm928_vm7, %v908_v47  ;;  %3024 = vmatprep.mubr.msk.f32.mxu0 %vm928_vm7, %v1509_v49  ;;  %v2109_v36 = vld [vmem:[#allocation3 + $0x40] sm:$0xff] }
 0x100   : > { %1926 = vst.msk [vmem:[#allocation3 + $0x50] sm:$0xff] %vm390_vm0, %v3534_v19  ;;  %1927 = vst.msk [vmem:[#allocation3 + $0x58] sm:$0xff] %vm390_vm0, %v3527_v18  ;;  %2974 = vmatmul.mubr.msk.f32.gmra.mrb[12].mxu1 %vm928_vm7, %v909_v48  ;;  %3025 = vmatmul.mubr.msk.f32.gmra.mrb[10].mxu0 %vm928_vm7, %v1510_v11  ;;  %v713_v18 = vpop.permute.xlu1 %712  ;;  %v711_v19 = vpop.permute.xlu0 %710  ;;  %v2110_v47 = vld [vmem:[#allocation3 + $0x48] sm:$0xff] }
 0x101   : > { %1377 = vst.msk [vmem:[#allocation3 + $0x67] sm:$0xff] %vm617_vm4, %v516_v39  ;;  %1976 = vst.msk [vmem:[#allocation3 + $0x57] sm:$0xff] %vm617_vm4, %v516_v39 }
 0x102   : > { %1376 = vst.msk [vmem:[#allocation3 + $0x5f] sm:$0xfe] %vm615_vm2, %v514_v42  ;;  %1975 = vst.msk [vmem:[#allocation3 + $0x4f] sm:$0xfe] %vm615_vm2, %v514_v42 }
 0x103   : > { %1378 = vst.msk [vmem:[#allocation3 + $0x6f] sm:$0x1] %vm619_vm1, %v518_v10  ;;  %1977 = vst.msk [vmem:[#allocation3 + $0x5f] sm:$0x1] %vm619_vm1, %v518_v10 }
 0x104   : > { %1433 = vst.msk [vmem:[#allocation3 + $0x5e] sm:$0xfc] %vm810_vm3, %v709_v50  ;;  %2032 = vst.msk [vmem:[#allocation3 + $0x4e] sm:$0xfc] %vm810_vm3, %v709_v50  ;;  %v522_v52 = vpop.permute.xlu1 %521  ;;  %v520_v53 = vpop.permute.xlu0 %519 }
 0x105   : > { %836 = vst.msk [vmem:[#allocation3 + $0x7e] sm:$0x3] %vm814_vm5, %v713_v18  ;;  %1435 = vst.msk [vmem:[#allocation3 + $0x6e] sm:$0x3] %vm814_vm5, %v713_v18 }
 0x106   : > { %2034 = vst.msk [vmem:[#allocation3 + $0x5e] sm:$0x3] %vm814_vm5, %v713_v18 }
 0x107   : > { %835 = vst.msk [vmem:[#allocation3 + $0x76] sm:$0xff] %vm812_vm6, %v711_v19  ;;  %1434 = vst.msk [vmem:[#allocation3 + $0x66] sm:$0xff] %vm812_vm6, %v711_v19 }
 0x108   : > { %2033 = vst.msk [vmem:[#allocation3 + $0x56] sm:$0xff] %vm812_vm6, %v711_v19  ;;  %v715_v57 = vpop.permute.xlu1 %714  ;;  %v524_v58 = vpop.permute.xlu0 %523 }
 0x109   : > { %643 = vst.msk [vmem:[#allocation3 + $0x87] sm:$0xff] %vm617_vm4, %v522_v52 }
 0x10a   : > { %642 = vst.msk [vmem:[#allocation3 + $0x7f] sm:$0xfe] %vm615_vm2, %v520_v53 }
 0x10b   : > { %837 = vst.msk [vmem:[#allocation3 + $0x7e] sm:$0xfc] %vm810_vm3, %v715_v57 }
 0x10c   : > { %644 = vst.msk [vmem:[#allocation3 + $0x8f] sm:$0x1] %vm619_vm1, %v524_v58 }
 0x10e   : > { %v910_v54 = vld [vmem:[#allocation3 + $0x70] sm:$0xff]  ;;  %v911_v55 = vld [vmem:[#allocation3 + $0x78] sm:$0xff]  ;;  %v1511_v56 = vld [vmem:[#allocation3 + $0x60] sm:$0xff] }
 0x10f   : > { %1328 = vst.msk [vmem:[#allocation3 + $0x70] sm:$0xff] %vm390_vm0, %v3546_v21  ;;  %1329 = vst.msk [vmem:[#allocation3 + $0x78] sm:$0xff] %vm390_vm0, %v3537_v20  ;;  %v1512_v59 = vld [vmem:[#allocation3 + $0x68] sm:$0xff]  ;;  %2976 = vmatprep.mubr.msk.f32.mxu1 %vm928_vm7, %v910_v54  ;;  %3027 = vmatprep.mubr.msk.f32.mxu0 %vm928_vm7, %v1511_v56  ;;  %v2111_v48 = vld [vmem:[#allocation3 + $0x50] sm:$0xff] }
 0x110   : > { %1928 = vst.msk [vmem:[#allocation3 + $0x60] sm:$0xff] %vm390_vm0, %v3546_v21  ;;  %1929 = vst.msk [vmem:[#allocation3 + $0x68] sm:$0xff] %vm390_vm0, %v3537_v20  ;;  %2977 = vmatmul.mubr.msk.f32.gmra.mrb[14].mxu1 %vm928_vm7, %v911_v55  ;;  %3028 = vmatmul.mubr.msk.f32.gmra.mrb[12].mxu0 %vm928_vm7, %v1512_v59  ;;  %v719_v21 = vpop.permute.xlu1 %718  ;;  %v717_v20 = vpop.permute.xlu0 %716  ;;  %v2112_v51 = vld [vmem:[#allocation3 + $0x58] sm:$0xff] }
 0x111   : > { %1380 = vst.msk [vmem:[#allocation3 + $0x77] sm:$0xff] %vm617_vm4, %v522_v52  ;;  %1979 = vst.msk [vmem:[#allocation3 + $0x67] sm:$0xff] %vm617_vm4, %v522_v52 }
 0x112   : > { %1379 = vst.msk [vmem:[#allocation3 + $0x6f] sm:$0xfe] %vm615_vm2, %v520_v53  ;;  %1978 = vst.msk [vmem:[#allocation3 + $0x5f] sm:$0xfe] %vm615_vm2, %v520_v53 }
 0x113   : > { %1381 = vst.msk [vmem:[#allocation3 + $0x7f] sm:$0x1] %vm619_vm1, %v524_v58  ;;  %1980 = vst.msk [vmem:[#allocation3 + $0x6f] sm:$0x1] %vm619_vm1, %v524_v58 }
 0x114   : > { %1436 = vst.msk [vmem:[#allocation3 + $0x6e] sm:$0xfc] %vm810_vm3, %v715_v57  ;;  %2035 = vst.msk [vmem:[#allocation3 + $0x5e] sm:$0xfc] %vm810_vm3, %v715_v57  ;;  %v528_v12 = vpop.permute.xlu1 %527  ;;  %v526_v13 = vpop.permute.xlu0 %525 }
 0x115   : > { %839 = vst.msk [vmem:[#allocation3 + $0x8e] sm:$0x3] %vm814_vm5, %v719_v21  ;;  %1438 = vst.msk [vmem:[#allocation3 + $0x7e] sm:$0x3] %vm814_vm5, %v719_v21 }
 0x116   : > { %2037 = vst.msk [vmem:[#allocation3 + $0x6e] sm:$0x3] %vm814_vm5, %v719_v21 }
 0x117   : > { %838 = vst.msk [vmem:[#allocation3 + $0x86] sm:$0xff] %vm812_vm6, %v717_v20  ;;  %1437 = vst.msk [vmem:[#allocation3 + $0x76] sm:$0xff] %vm812_vm6, %v717_v20 }
 0x118   : > { %2036 = vst.msk [vmem:[#allocation3 + $0x66] sm:$0xff] %vm812_vm6, %v717_v20  ;;  %v721_v63 = vpop.permute.xlu1 %720  ;;  %v530_v0 = vpop.permute.xlu0 %529 }
 0x119   : > { %646 = vst.msk [vmem:[#allocation3 + $0x97] sm:$0xff] %vm617_vm4, %v528_v12 }
 0x11a   : > { %645 = vst.msk [vmem:[#allocation3 + $0x8f] sm:$0xfe] %vm615_vm2, %v526_v13 }
 0x11b   : > { %840 = vst.msk [vmem:[#allocation3 + $0x8e] sm:$0xfc] %vm810_vm3, %v721_v63 }
 0x11c   : > { %647 = vst.msk [vmem:[#allocation3 + $0x9f] sm:$0x1] %vm619_vm1, %v530_v0  ;;  %v723_v2 = vpop.permute.xlu0 %722 }
 0x11d   : > { %841 = vst.msk [vmem:[#allocation3 + $0x96] sm:$0xff] %vm812_vm6, %v723_v2 }
 0x11e   : > { %v912_v60 = vld [vmem:[#allocation3 + $0x80] sm:$0xff]  ;;  %v913_v61 = vld [vmem:[#allocation3 + $0x88] sm:$0xff]  ;;  %v1513_v62 = vld [vmem:[#allocation3 + $0x70] sm:$0xff] }
 0x11f   : > { %1330 = vst.msk [vmem:[#allocation3 + $0x80] sm:$0xff] %vm390_vm0, %v3556_v23  ;;  %1331 = vst.msk [vmem:[#allocation3 + $0x88] sm:$0xff] %vm390_vm0, %v3553_v22  ;;  %v1514_v1 = vld [vmem:[#allocation3 + $0x78] sm:$0xff]  ;;  %2979 = vmatprep.mubr.msk.f32.mxu1 %vm928_vm7, %v912_v60  ;;  %3030 = vmatprep.mubr.msk.f32.mxu0 %vm928_vm7, %v1513_v62  ;;  %v2114_v53 = vld [vmem:[#allocation3 + $0x68] sm:$0xff] }
 0x120   : > { %1930 = vst.msk [vmem:[#allocation3 + $0x70] sm:$0xff] %vm390_vm0, %v3556_v23  ;;  %1931 = vst.msk [vmem:[#allocation3 + $0x78] sm:$0xff] %vm390_vm0, %v3553_v22  ;;  %2980 = vmatmul.mubr.msk.f32.gmra.mrb[16].mxu1 %vm928_vm7, %v913_v61  ;;  %3031 = vmatmul.mubr.msk.f32.gmra.mrb[14].mxu0 %vm928_vm7, %v1514_v1  ;;  %v2101_v23 = vld [vmem:[#allocation3] sm:$0xff]  ;;  %v725_v22 = vpop.permute.xlu1 %724  ;;  %v532_v15 = vpop.permute.xlu0 %531 }
 0x121   : > { %1383 = vst.msk [vmem:[#allocation3 + $0x87] sm:$0xff] %vm617_vm4, %v528_v12  ;;  %1982 = vst.msk [vmem:[#allocation3 + $0x77] sm:$0xff] %vm617_vm4, %v528_v12  ;;  %3063 = vmatprep.mubr.msk.f32.mxu0 %vm928_vm7, %v2101_v23 }
 0x122   : > { %1382 = vst.msk [vmem:[#allocation3 + $0x7f] sm:$0xfe] %vm615_vm2, %v526_v13  ;;  %1981 = vst.msk [vmem:[#allocation3 + $0x6f] sm:$0xfe] %vm615_vm2, %v526_v13 }
 0x123   : > { %1384 = vst.msk [vmem:[#allocation3 + $0x8f] sm:$0x1] %vm619_vm1, %v530_v0  ;;  %1983 = vst.msk [vmem:[#allocation3 + $0x7f] sm:$0x1] %vm619_vm1, %v530_v0 }
 0x124   : > { %1439 = vst.msk [vmem:[#allocation3 + $0x7e] sm:$0xfc] %vm810_vm3, %v721_v63  ;;  %2038 = vst.msk [vmem:[#allocation3 + $0x6e] sm:$0xfc] %vm810_vm3, %v721_v63  ;;  %3064 = vmatmul.mubr.msk.f32.vlgmr.msra.gmra.mrb[0].mxu0 %vm928_vm7, %v2102_v3  ;;  %v534_v14 = vpop.permute.xlu1 %533  ;;  %v914_v7 = vld [vmem:[#allocation3 + $0x90] sm:$0xff]  ;;  %v536_v8 = vpop.permute.xlu0 %535 }
 0x125   : > { %842 = vst.msk [vmem:[#allocation3 + $0x9e] sm:$0x3] %vm814_vm5, %v725_v22  ;;  %1441 = vst.msk [vmem:[#allocation3 + $0x8e] sm:$0x3] %vm814_vm5, %v725_v22  ;;  %3066 = vmatprep.mubr.msk.f32.mxu0 %vm928_vm7, %v2103_v4  ;;  %2982 = vmatprep.mubr.msk.f32.mxu1 %vm928_vm7, %v914_v7 }
 0x126   : > { %2040 = vst.msk [vmem:[#allocation3 + $0x7e] sm:$0x3] %vm814_vm5, %v725_v22 }
 0x127   : > { %1440 = vst.msk [vmem:[#allocation3 + $0x86] sm:$0xff] %vm812_vm6, %v723_v2  ;;  %2039 = vst.msk [vmem:[#allocation3 + $0x76] sm:$0xff] %vm812_vm6, %v723_v2 }
 0x128   : > { %649 = vst.msk [vmem:[#allocation3 + $0xa7] sm:$0xff] %vm617_vm4, %v534_v14  ;;  %3067 = vmatmul.mubr.msk.f32.gmra.mrb[2].mxu0 %vm928_vm7, %v2104_v5  ;;  %v727_v32 = vpop.permute.xlu1 %726  ;;  %v729_v16 = vpop.permute.xlu0 %728 }
 0x129   : > { %648 = vst.msk [vmem:[#allocation3 + $0x9f] sm:$0xfe] %vm615_vm2, %v532_v15  ;;  %3069 = vmatprep.mubr.msk.f32.mxu0 %vm928_vm7, %v2105_v6 }
 0x12a   : > { %1332 = vst.msk [vmem:[#allocation3 + $0x90] sm:$0xff] %vm390_vm0, %v3568_v25 }
 0x12b   : > { %843 = vst.msk [vmem:[#allocation3 + $0x9e] sm:$0xfc] %vm810_vm3, %v727_v32 }
 0x12c   : > { %v915_v30 = vld [vmem:[#allocation3 + $0x98] sm:$0xff]  ;;  %650 = vst.msk [vmem:[#allocation3 + $0xaf] sm:$0x1] %vm619_vm1, %v536_v8  ;;  %3070 = vmatmul.mubr.msk.f32.gmra.mrb[4].mxu0 %vm928_vm7, %v2106_v33  ;;  %v538_v42 = vpop.permute.xlu0 %537 }
 0x12d   : > { %1333 = vst.msk [vmem:[#allocation3 + $0x98] sm:$0xff] %vm390_vm0, %v3565_v24  ;;  %2983 = vmatmul.mubr.msk.f32.gmra.mrb[18].mxu1 %vm928_vm7, %v915_v30 }
 0x12e   : > { %v4137_v31 = vld [vmem:[#allocation3 + $0x80] sm:$0xff]  ;;  %v4143_v9 = vld [vmem:[#allocation3 + $0x88] sm:$0xff]  ;;  %1386 = vst.msk [vmem:[#allocation3 + $0x97] sm:$0xff] %vm617_vm4, %v534_v14  ;;  %v2115_v54 = vld [vmem:[#allocation3 + $0x70] sm:$0xff] }
 0x12f   : > { %1932 = vst.msk [vmem:[#allocation3 + $0x80] sm:$0xff] %vm390_vm0, %v3568_v25  ;;  %1933 = vst.msk [vmem:[#allocation3 + $0x88] sm:$0xff] %vm390_vm0, %v3565_v24  ;;  %v2107_v25 = vld [vmem:[#allocation3 + $0x30] sm:$0xff]  ;;  %v731_v24 = vpop.permute.xlu1 %730  ;;  %v2116_v57 = vld [vmem:[#allocation3 + $0x78] sm:$0xff] }
 0x130   : > { %1385 = vst.msk [vmem:[#allocation3 + $0x8f] sm:$0xfe] %vm615_vm2, %v532_v15  ;;  %1984 = vst.msk [vmem:[#allocation3 + $0x7f] sm:$0xfe] %vm615_vm2, %v532_v15  ;;  %3072 = vmatprep.mubr.msk.f32.mxu0 %vm928_vm7, %v2107_v25  ;;  %v542_v18 = vpop.permute.xlu0 %541 }
 0x131   : > { %1387 = vst.msk [vmem:[#allocation3 + $0x9f] sm:$0x1] %vm619_vm1, %v536_v8  ;;  %1986 = vst.msk [vmem:[#allocation3 + $0x8f] sm:$0x1] %vm619_vm1, %v536_v8  ;;  %3073 = vmatmul.mubr.msk.f32.gmra.mrb[6].mxu0 %vm928_vm7, %v2108_v17 }
 0x132   : > { %1985 = vst.msk [vmem:[#allocation3 + $0x87] sm:$0xff] %vm617_vm4, %v534_v14  ;;  %3075 = vmatprep.mubr.msk.f32.mxu0 %vm928_vm7, %v2109_v36 }
 0x133   : > { %1442 = vst.msk [vmem:[#allocation3 + $0x8e] sm:$0xfc] %vm810_vm3, %v727_v32  ;;  %2041 = vst.msk [vmem:[#allocation3 + $0x7e] sm:$0xfc] %vm810_vm3, %v727_v32  ;;  %v540_v39 = vpop.permute.xlu1 %539 }
 0x134   : > { %845 = vst.msk [vmem:[#allocation3 + $0xae] sm:$0x3] %vm814_vm5, %v731_v24  ;;  %1444 = vst.msk [vmem:[#allocation3 + $0x9e] sm:$0x3] %vm814_vm5, %v731_v24  ;;  %v735_v52 = vpop.permute.xlu0 %734 }
 0x135   : > { %2043 = vst.msk [vmem:[#allocation3 + $0x8e] sm:$0x3] %vm814_vm5, %v731_v24  ;;  %3076 = vmatmul.mubr.msk.f32.gmra.mrb[8].mxu0 %vm928_vm7, %v2110_v47 }
 0x136   : > { %844 = vst.msk [vmem:[#allocation3 + $0xa6] sm:$0xff] %vm812_vm6, %v729_v16  ;;  %1443 = vst.msk [vmem:[#allocation3 + $0x96] sm:$0xff] %vm812_vm6, %v729_v16  ;;  %3078 = vmatprep.mubr.msk.f32.mxu0 %vm928_vm7, %v2111_v48 }
 0x137   : > { %2042 = vst.msk [vmem:[#allocation3 + $0x86] sm:$0xff] %vm812_vm6, %v729_v16  ;;  %v733_v11 = vpop.permute.xlu1 %732 }
 0x138   : > { %652 = vst.msk [vmem:[#allocation3 + $0xb7] sm:$0xff] %vm617_vm4, %v540_v39  ;;  %v544_v56 = vpop.permute.xlu0 %543 }
 0x139   : > { %651 = vst.msk [vmem:[#allocation3 + $0xaf] sm:$0xfe] %vm615_vm2, %v538_v42  ;;  %3079 = vmatmul.mubr.msk.f32.gmra.mrb[10].mxu0 %vm928_vm7, %v2112_v51  ;;  %654 = vst.msk [vmem:[#allocation3 + $0xbf] sm:$0xfe] %vm615_vm2, %v544_v56 }
 0x13a   : > { %846 = vst.msk [vmem:[#allocation3 + $0xae] sm:$0xfc] %vm810_vm3, %v733_v11 }
 0x13b   : > { %653 = vst.msk [vmem:[#allocation3 + $0xbf] sm:$0x1] %vm619_vm1, %v542_v18 }
 0x13c   : > { %847 = vst.msk [vmem:[#allocation3 + $0xb6] sm:$0xff] %vm812_vm6, %v735_v52  ;;  %v548_v60 = vpop.permute.xlu0 %547 }
 0x13d   : > { %v916_v49 = vld [vmem:[#allocation3 + $0xa0] sm:$0xff]  ;;  %v917_v50 = vld [vmem:[#allocation3 + $0xa8] sm:$0xff]  ;;  %v4175_v10 = vld [vmem:[#allocation3 + $0x90] sm:$0xff]  ;;  %656 = vst.msk [vmem:[#allocation3 + $0xcf] sm:$0x1] %vm619_vm1, %v548_v60 }
 0x13e   : > { %1334 = vst.msk [vmem:[#allocation3 + $0xa0] sm:$0xff] %vm390_vm0, %v3581_v28  ;;  %1335 = vst.msk [vmem:[#allocation3 + $0xa8] sm:$0xff] %vm390_vm0, %v3578_v27  ;;  %v4181_v19 = vld [vmem:[#allocation3 + $0x98] sm:$0xff]  ;;  %2985 = vmatprep.mubr.msk.f32.mxu1 %vm928_vm7, %v916_v49  ;;  %v2117_v58 = vld [vmem:[#allocation3 + $0x80] sm:$0xff] }
 0x13f   : > { %1934 = vst.msk [vmem:[#allocation3 + $0x90] sm:$0xff] %vm390_vm0, %v3581_v28  ;;  %1935 = vst.msk [vmem:[#allocation3 + $0x98] sm:$0xff] %vm390_vm0, %v3578_v27  ;;  %2986 = vmatmul.mubr.msk.f32.gmra.mrb[20].mxu1 %vm928_vm7, %v917_v50  ;;  %v2113_v28 = vld [vmem:[#allocation3 + $0x60] sm:$0xff]  ;;  %v737_v27 = vpop.permute.xlu1 %736  ;;  %v2118_v61 = vld [vmem:[#allocation3 + $0x88] sm:$0xff] }
 0x140   : > { %1389 = vst.msk [vmem:[#allocation3 + $0xa7] sm:$0xff] %vm617_vm4, %v540_v39  ;;  %1988 = vst.msk [vmem:[#allocation3 + $0x97] sm:$0xff] %vm617_vm4, %v540_v39  ;;  %3081 = vmatprep.mubr.msk.f32.mxu0 %vm928_vm7, %v2113_v28  ;;  %v741_v62 = vpop.permute.xlu0 %740 }
 0x141   : > { %1388 = vst.msk [vmem:[#allocation3 + $0x9f] sm:$0xfe] %vm615_vm2, %v538_v42  ;;  %1987 = vst.msk [vmem:[#allocation3 + $0x8f] sm:$0xfe] %vm615_vm2, %v538_v42  ;;  %3082 = vmatmul.mubr.msk.f32.gmra.mrb[12].mxu0 %vm928_vm7, %v2114_v53 }
 0x142   : > { %1390 = vst.msk [vmem:[#allocation3 + $0xaf] sm:$0x1] %vm619_vm1, %v542_v18  ;;  %1989 = vst.msk [vmem:[#allocation3 + $0x9f] sm:$0x1] %vm619_vm1, %v542_v18  ;;  %3084 = vmatprep.mubr.msk.f32.mxu0 %vm928_vm7, %v2115_v54 }
 0x143   : > { %1445 = vst.msk [vmem:[#allocation3 + $0x9e] sm:$0xfc] %vm810_vm3, %v733_v11  ;;  %2044 = vst.msk [vmem:[#allocation3 + $0x8e] sm:$0xfc] %vm810_vm3, %v733_v11  ;;  %v546_v55 = vpop.permute.xlu1 %545  ;;  %v918_v59 = vld [vmem:[#allocation3 + $0xb0] sm:$0xff] }
 0x144   : > { %848 = vst.msk [vmem:[#allocation3 + $0xbe] sm:$0x3] %vm814_vm5, %v737_v27  ;;  %1447 = vst.msk [vmem:[#allocation3 + $0xae] sm:$0x3] %vm814_vm5, %v737_v27  ;;  %2988 = vmatprep.mubr.msk.f32.mxu1 %vm928_vm7, %v918_v59  ;;  %v550_v1 = vpop.permute.xlu0 %549 }
 0x145   : > { %2046 = vst.msk [vmem:[#allocation3 + $0x9e] sm:$0x3] %vm814_vm5, %v737_v27  ;;  %3085 = vmatmul.mubr.msk.f32.gmra.mrb[14].mxu0 %vm928_vm7, %v2116_v57 }
 0x146   : > { %1446 = vst.msk [vmem:[#allocation3 + $0xa6] sm:$0xff] %vm812_vm6, %v735_v52  ;;  %2045 = vst.msk [vmem:[#allocation3 + $0x96] sm:$0xff] %vm812_vm6, %v735_v52  ;;  %3087 = vmatprep.mubr.msk.f32.mxu0 %vm928_vm7, %v2117_v58 }
 0x147   : > { %655 = vst.msk [vmem:[#allocation3 + $0xc7] sm:$0xff] %vm617_vm4, %v546_v55  ;;  %v739_v12 = vpop.permute.xlu1 %738 }
 0x148   : > { %1336 = vst.msk [vmem:[#allocation3 + $0xb0] sm:$0xff] %vm390_vm0, %v3612_v35  ;;  %v554_v4 = vpop.permute.xlu0 %553 }
 0x149   : > { %849 = vst.msk [vmem:[#allocation3 + $0xbe] sm:$0xfc] %vm810_vm3, %v739_v12  ;;  %3088 = vmatmul.mubr.msk.f32.gmra.mrb[16].mxu0 %vm928_vm7, %v2118_v61 }
 0x14a   : > { %1391 = vst.msk [vmem:[#allocation3 + $0xaf] sm:$0xfe] %vm615_vm2, %v544_v56  ;;  %657 = vst.msk [vmem:[#allocation3 + $0xcf] sm:$0xfe] %vm615_vm2, %v550_v1 }
 0x14b   : > { %v919_v21 = vld [vmem:[#allocation3 + $0xb8] sm:$0xff]  ;;  %1448 = vst.msk [vmem:[#allocation3 + $0xae] sm:$0xfc] %vm810_vm3, %v739_v12 }
 0x14c   : > { %1337 = vst.msk [vmem:[#allocation3 + $0xb8] sm:$0xff] %vm390_vm0, %v3609_v34  ;;  %2989 = vmatmul.mubr.msk.f32.gmra.mrb[22].mxu1 %vm928_vm7, %v919_v21 }
 0x14d   : > { %v4213_v20 = vld [vmem:[#allocation3 + $0xa0] sm:$0xff]  ;;  %v4219_v13 = vld [vmem:[#allocation3 + $0xa8] sm:$0xff]  ;;  %1392 = vst.msk [vmem:[#allocation3 + $0xb7] sm:$0xff] %vm617_vm4, %v546_v55  ;;  %v2120_v63 = vld [vmem:[#allocation3 + $0x98] sm:$0xff] }
 0x14e   : > { %1936 = vst.msk [vmem:[#allocation3 + $0xa0] sm:$0xff] %vm390_vm0, %v3612_v35  ;;  %1937 = vst.msk [vmem:[#allocation3 + $0xa8] sm:$0xff] %vm390_vm0, %v3609_v34  ;;  %v2119_v35 = vld [vmem:[#allocation3 + $0x90] sm:$0xff]  ;;  %v743_v34 = vpop.permute.xlu1 %742 }
 0x14f   : > { %1990 = vst.msk [vmem:[#allocation3 + $0x9f] sm:$0xfe] %vm615_vm2, %v544_v56  ;;  %3090 = vmatprep.mubr.msk.f32.mxu0 %vm928_vm7, %v2119_v35 }
 0x150   : > { %1393 = vst.msk [vmem:[#allocation3 + $0xbf] sm:$0x1] %vm619_vm1, %v548_v60  ;;  %1992 = vst.msk [vmem:[#allocation3 + $0xaf] sm:$0x1] %vm619_vm1, %v548_v60  ;;  %3091 = vmatmul.mubr.msk.f32.gmra.mrb[18].mxu0 %vm928_vm7, %v2120_v63 }
 0x151   : > { %1991 = vst.msk [vmem:[#allocation3 + $0xa7] sm:$0xff] %vm617_vm4, %v546_v55 }
 0x152   : > { %2047 = vst.msk [vmem:[#allocation3 + $0x9e] sm:$0xfc] %vm810_vm3, %v739_v12  ;;  %v552_v0 = vpop.permute.xlu1 %551 }
 0x153   : > { %851 = vst.msk [vmem:[#allocation3 + $0xce] sm:$0x3] %vm814_vm5, %v743_v34  ;;  %1450 = vst.msk [vmem:[#allocation3 + $0xbe] sm:$0x3] %vm814_vm5, %v743_v34 }
 0x154   : > { %2049 = vst.msk [vmem:[#allocation3 + $0xae] sm:$0x3] %vm814_vm5, %v743_v34 }
 0x155   : > { %850 = vst.msk [vmem:[#allocation3 + $0xc6] sm:$0xff] %vm812_vm6, %v741_v62  ;;  %1449 = vst.msk [vmem:[#allocation3 + $0xb6] sm:$0xff] %vm812_vm6, %v741_v62 }
 0x156   : > { %2048 = vst.msk [vmem:[#allocation3 + $0xa6] sm:$0xff] %vm812_vm6, %v741_v62  ;;  %v745_v23 = vpop.permute.xlu1 %744 }
 0x157   : > { %658 = vst.msk [vmem:[#allocation3 + $0xd7] sm:$0xff] %vm617_vm4, %v552_v0 }
 0x158   : > { %852 = vst.msk [vmem:[#allocation3 + $0xce] sm:$0xfc] %vm810_vm3, %v745_v23 }
 0x159   : > { %659 = vst.msk [vmem:[#allocation3 + $0xdf] sm:$0x1] %vm619_vm1, %v554_v4 }
 0x15c   : > { %v920_v22 = vld [vmem:[#allocation3 + $0xc0] sm:$0xff]  ;;  %v921_v2 = vld [vmem:[#allocation3 + $0xc8] sm:$0xff]  ;;  %v4248_v3 = vld [vmem:[#allocation3 + $0xb0] sm:$0xff] }
 0x15d   : > { %1338 = vst.msk [vmem:[#allocation3 + $0xc0] sm:$0xff] %vm390_vm0, %v3638_v38  ;;  %1339 = vst.msk [vmem:[#allocation3 + $0xc8] sm:$0xff] %vm390_vm0, %v3635_v37  ;;  %v4255_v14 = vld [vmem:[#allocation3 + $0xb8] sm:$0xff]  ;;  %2991 = vmatprep.mubr.msk.f32.mxu1 %vm928_vm7, %v920_v22  ;;  %v2121_v15 = vld [vmem:[#allocation3 + $0xa0] sm:$0xff] }
 0x15e   : > { %1938 = vst.msk [vmem:[#allocation3 + $0xb0] sm:$0xff] %vm390_vm0, %v3638_v38  ;;  %v2122_v5 = vld [vmem:[#allocation3 + $0xa8] sm:$0xff]  ;;  %1939 = vst.msk [vmem:[#allocation3 + $0xb8] sm:$0xff] %vm390_vm0, %v3635_v37  ;;  %3093 = vmatprep.mubr.msk.f32.mxu0 %vm928_vm7, %v2121_v15  ;;  %2992 = vmatmul.mubr.msk.f32.gmra.mrb[24].mxu1 %vm928_vm7, %v921_v2  ;;  %v749_v37 = vpop.permute.xlu1 %748  ;;  %v747_v38 = vpop.permute.xlu0 %746 }
 0x15f   : > { %1395 = vst.msk [vmem:[#allocation3 + $0xc7] sm:$0xff] %vm617_vm4, %v552_v0  ;;  %1994 = vst.msk [vmem:[#allocation3 + $0xb7] sm:$0xff] %vm617_vm4, %v552_v0  ;;  %3094 = vmatmul.mubr.msk.f32.gmra.mrb[20].mxu0 %vm928_vm7, %v2122_v5 }
 0x160   : > { %1394 = vst.msk [vmem:[#allocation3 + $0xbf] sm:$0xfe] %vm615_vm2, %v550_v1  ;;  %1993 = vst.msk [vmem:[#allocation3 + $0xaf] sm:$0xfe] %vm615_vm2, %v550_v1 }
 0x161   : > { %1396 = vst.msk [vmem:[#allocation3 + $0xcf] sm:$0x1] %vm619_vm1, %v554_v4  ;;  %1995 = vst.msk [vmem:[#allocation3 + $0xbf] sm:$0x1] %vm619_vm1, %v554_v4 }
 0x162   : > { %1451 = vst.msk [vmem:[#allocation3 + $0xbe] sm:$0xfc] %vm810_vm3, %v745_v23  ;;  %2050 = vst.msk [vmem:[#allocation3 + $0xae] sm:$0xfc] %vm810_vm3, %v745_v23  ;;  %v558_v6 = vpop.permute.xlu1 %557  ;;  %v556_v7 = vpop.permute.xlu0 %555 }
 0x163   : > { %854 = vst.msk [vmem:[#allocation3 + $0xde] sm:$0x3] %vm814_vm5, %v749_v37  ;;  %1453 = vst.msk [vmem:[#allocation3 + $0xce] sm:$0x3] %vm814_vm5, %v749_v37 }
 0x164   : > { %2052 = vst.msk [vmem:[#allocation3 + $0xbe] sm:$0x3] %vm814_vm5, %v749_v37 }
 0x165   : > { %853 = vst.msk [vmem:[#allocation3 + $0xd6] sm:$0xff] %vm812_vm6, %v747_v38  ;;  %1452 = vst.msk [vmem:[#allocation3 + $0xc6] sm:$0xff] %vm812_vm6, %v747_v38 }
 0x166   : > { %2051 = vst.msk [vmem:[#allocation3 + $0xb6] sm:$0xff] %vm812_vm6, %v747_v38  ;;  %v751_v30 = vpop.permute.xlu1 %750  ;;  %v560_v25 = vpop.permute.xlu0 %559 }
 0x167   : > { %661 = vst.msk [vmem:[#allocation3 + $0xe7] sm:$0xff] %vm617_vm4, %v558_v6 }
 0x168   : > { %660 = vst.msk [vmem:[#allocation3 + $0xdf] sm:$0xfe] %vm615_vm2, %v556_v7 }
 0x169   : > { %855 = vst.msk [vmem:[#allocation3 + $0xde] sm:$0xfc] %vm810_vm3, %v751_v30 }
 0x16a   : > { %662 = vst.msk [vmem:[#allocation3 + $0xef] sm:$0x1] %vm619_vm1, %v560_v25 }
 0x16c   : > { %v922_v32 = vld [vmem:[#allocation3 + $0xd0] sm:$0xff]  ;;  %v923_v8 = vld [vmem:[#allocation3 + $0xd8] sm:$0xff]  ;;  %v4282_v33 = vld [vmem:[#allocation3 + $0xc0] sm:$0xff] }
 0x16d   : > { %1340 = vst.msk [vmem:[#allocation3 + $0xd0] sm:$0xff] %vm390_vm0, %v3659_v41  ;;  %1341 = vst.msk [vmem:[#allocation3 + $0xd8] sm:$0xff] %vm390_vm0, %v3656_v40  ;;  %v4289_v24 = vld [vmem:[#allocation3 + $0xc8] sm:$0xff]  ;;  %2994 = vmatprep.mubr.msk.f32.mxu1 %vm928_vm7, %v922_v32  ;;  %v2123_v16 = vld [vmem:[#allocation3 + $0xb0] sm:$0xff] }
 0x16e   : > { %1940 = vst.msk [vmem:[#allocation3 + $0xc0] sm:$0xff] %vm390_vm0, %v3659_v41  ;;  %v2124_v17 = vld [vmem:[#allocation3 + $0xb8] sm:$0xff]  ;;  %1941 = vst.msk [vmem:[#allocation3 + $0xc8] sm:$0xff] %vm390_vm0, %v3656_v40  ;;  %3096 = vmatprep.mubr.msk.f32.mxu0 %vm928_vm7, %v2123_v16  ;;  %2995 = vmatmul.mubr.msk.f32.gmra.mrb[26].mxu1 %vm928_vm7, %v923_v8  ;;  %v755_v40 = vpop.permute.xlu1 %754  ;;  %v753_v41 = vpop.permute.xlu0 %752 }
 0x16f   : > { %1398 = vst.msk [vmem:[#allocation3 + $0xd7] sm:$0xff] %vm617_vm4, %v558_v6  ;;  %1997 = vst.msk [vmem:[#allocation3 + $0xc7] sm:$0xff] %vm617_vm4, %v558_v6  ;;  %3097 = vmatmul.mubr.msk.f32.gmra.mrb[22].mxu0 %vm928_vm7, %v2124_v17  ;;  %v4421_v6 = vld [vmem:[%s4552_s3] ss:$0 sm:$0xff] }
 0x170   : > { %1397 = vst.msk [vmem:[#allocation3 + $0xcf] sm:$0xfe] %vm615_vm2, %v556_v7  ;;  %1996 = vst.msk [vmem:[#allocation3 + $0xbf] sm:$0xfe] %vm615_vm2, %v556_v7 }
 0x171   : > { %1399 = vst.msk [vmem:[#allocation3 + $0xdf] sm:$0x1] %vm619_vm1, %v560_v25  ;;  %1998 = vst.msk [vmem:[#allocation3 + $0xcf] sm:$0x1] %vm619_vm1, %v560_v25 }
 0x172   : > { %1454 = vst.msk [vmem:[#allocation3 + $0xce] sm:$0xfc] %vm810_vm3, %v751_v30  ;;  %2053 = vst.msk [vmem:[#allocation3 + $0xbe] sm:$0xfc] %vm810_vm3, %v751_v30  ;;  %v564_v36 = vpop.permute.xlu1 %563  ;;  %v562_v39 = vpop.permute.xlu0 %561 }
 0x173   : > { %857 = vst.msk [vmem:[#allocation3 + $0xee] sm:$0x3] %vm814_vm5, %v755_v40  ;;  %1456 = vst.msk [vmem:[#allocation3 + $0xde] sm:$0x3] %vm814_vm5, %v755_v40 }
 0x174   : > { %2055 = vst.msk [vmem:[#allocation3 + $0xce] sm:$0x3] %vm814_vm5, %v755_v40 }
 0x175   : > { %856 = vst.msk [vmem:[#allocation3 + $0xe6] sm:$0xff] %vm812_vm6, %v753_v41  ;;  %1455 = vst.msk [vmem:[#allocation3 + $0xd6] sm:$0xff] %vm812_vm6, %v753_v41 }
 0x176   : > { %2054 = vst.msk [vmem:[#allocation3 + $0xc6] sm:$0xff] %vm812_vm6, %v753_v41  ;;  %v757_v42 = vpop.permute.xlu1 %756  ;;  %v566_v50 = vpop.permute.xlu0 %565 }
 0x177   : > { %664 = vst.msk [vmem:[#allocation3 + $0xf7] sm:$0xff] %vm617_vm4, %v564_v36 }
 0x178   : > { %663 = vst.msk [vmem:[#allocation3 + $0xef] sm:$0xfe] %vm615_vm2, %v562_v39 }
 0x179   : > { %858 = vst.msk [vmem:[#allocation3 + $0xee] sm:$0xfc] %vm810_vm3, %v757_v42 }
 0x17a   : > { %665 = vst.msk [vmem:[#allocation3 + $0xff] sm:$0x1] %vm619_vm1, %v566_v50 }
 0x17c   : > { %v924_v47 = vld [vmem:[#allocation3 + $0xe0] sm:$0xff]  ;;  %v925_v48 = vld [vmem:[#allocation3 + $0xe8] sm:$0xff]  ;;  %v4316_v49 = vld [vmem:[#allocation3 + $0xd0] sm:$0xff] }
 0x17d   : > { %1342 = vst.msk [vmem:[#allocation3 + $0xe0] sm:$0xff] %vm390_vm0, %v3680_v44  ;;  %1343 = vst.msk [vmem:[#allocation3 + $0xe8] sm:$0xff] %vm390_vm0, %v3677_v43  ;;  %v4323_v11 = vld [vmem:[#allocation3 + $0xd8] sm:$0xff]  ;;  %2997 = vmatprep.mubr.msk.f32.mxu1 %vm928_vm7, %v924_v47  ;;  %v2125_v18 = vld [vmem:[#allocation3 + $0xc0] sm:$0xff] }
 0x17e   : > { %1942 = vst.msk [vmem:[#allocation3 + $0xd0] sm:$0xff] %vm390_vm0, %v3680_v44  ;;  %v2126_v51 = vld [vmem:[#allocation3 + $0xc8] sm:$0xff]  ;;  %1943 = vst.msk [vmem:[#allocation3 + $0xd8] sm:$0xff] %vm390_vm0, %v3677_v43  ;;  %3099 = vmatprep.mubr.msk.f32.mxu0 %vm928_vm7, %v2125_v18  ;;  %2998 = vmatmul.mubr.msk.f32.gmra.mrb[28].mxu1 %vm928_vm7, %v925_v48  ;;  %v761_v43 = vpop.permute.xlu1 %760  ;;  %v759_v44 = vpop.permute.xlu0 %758 }
 0x17f   : > { %1401 = vst.msk [vmem:[#allocation3 + $0xe7] sm:$0xff] %vm617_vm4, %v564_v36  ;;  %2000 = vst.msk [vmem:[#allocation3 + $0xd7] sm:$0xff] %vm617_vm4, %v564_v36  ;;  %3100 = vmatmul.mubr.msk.f32.gmra.mrb[24].mxu0 %vm928_vm7, %v2126_v51 }
 0x180   : > { %1400 = vst.msk [vmem:[#allocation3 + $0xdf] sm:$0xfe] %vm615_vm2, %v562_v39  ;;  %1999 = vst.msk [vmem:[#allocation3 + $0xcf] sm:$0xfe] %vm615_vm2, %v562_v39 }
 0x181   : > { %1402 = vst.msk [vmem:[#allocation3 + $0xef] sm:$0x1] %vm619_vm1, %v566_v50  ;;  %2001 = vst.msk [vmem:[#allocation3 + $0xdf] sm:$0x1] %vm619_vm1, %v566_v50 }
 0x182   : > { %1457 = vst.msk [vmem:[#allocation3 + $0xde] sm:$0xfc] %vm810_vm3, %v757_v42  ;;  %2056 = vst.msk [vmem:[#allocation3 + $0xce] sm:$0xfc] %vm810_vm3, %v757_v42  ;;  %v1350_v28 = vpop.permute.xlu0 %1349  ;;  %v1352_v27 = vpop.permute.xlu1 %1351 }
 0x183   : > { %860 = vst.msk [vmem:[#allocation3 + $0xfe] sm:$0x3] %vm814_vm5, %v761_v43  ;;  %1459 = vst.msk [vmem:[#allocation3 + $0xee] sm:$0x3] %vm814_vm5, %v761_v43 }
 0x184   : > { %2058 = vst.msk [vmem:[#allocation3 + $0xde] sm:$0x3] %vm814_vm5, %v761_v43 }
 0x185   : > { %859 = vst.msk [vmem:[#allocation3 + $0xf6] sm:$0xff] %vm812_vm6, %v759_v44  ;;  %1458 = vst.msk [vmem:[#allocation3 + $0xe6] sm:$0xff] %vm812_vm6, %v759_v44 }
 0x186   : > { %2057 = vst.msk [vmem:[#allocation3 + $0xd6] sm:$0xff] %vm812_vm6, %v759_v44  ;;  %v1354_v55 = vpop.permute.xlu0 %1353  ;;  %v1407_v56 = vpop.permute.xlu1 %1406 }
 0x18c   : > { %v926_v52 = vld [vmem:[#allocation3 + $0xf0] sm:$0xff]  ;;  %v4348_v53 = vld [vmem:[#allocation3 + $0xe0] sm:$0xff]  ;;  %v927_v57 = vld [vmem:[#allocation3 + $0xf8] sm:$0xff] }
 0x18d   : > { %v2127_v54 = vld [vmem:[#allocation3 + $0xd0] sm:$0xff]  ;;  %1344 = vst.msk [vmem:[#allocation3 + $0xf0] sm:$0xff] %vm390_vm0, %v3979_v26  ;;  %1944 = vst.msk [vmem:[#allocation3 + $0xe0] sm:$0xff] %vm390_vm0, %v3979_v26  ;;  %3000 = vmatprep.mubr.msk.f32.mxu1 %vm928_vm7, %v926_v52  ;;  %v1528_v58 = vld [vmem:[#allocation3 + $0xe8] sm:$0xff]  ;;  %v1409_v26 = vpop.permute.xlu0 %1408 }
 0x18e   : > { %3102 = vmatprep.mubr.msk.f32.mxu0 %vm928_vm7, %v2127_v54  ;;  %v2128_v59 = vld [vmem:[#allocation3 + $0xd8] sm:$0xff]  ;;  %1403 = vst.msk [vmem:[#allocation3 + $0xef] sm:$0xfe] %vm615_vm2, %v1350_v28  ;;  %2002 = vst.msk [vmem:[#allocation3 + $0xdf] sm:$0xfe] %vm615_vm2, %v1350_v28  ;;  %3001 = vmatmul.mubr.msk.f32.gmra.mrb[30].mxu1 %vm928_vm7, %v927_v57 }
 0x18f   : > { %1345 = vst.msk [vmem:[#allocation3 + $0xf8] sm:$0xff] %vm390_vm0, %v3982_v29  ;;  %1945 = vst.msk [vmem:[#allocation3 + $0xe8] sm:$0xff] %vm390_vm0, %v3982_v29  ;;  %3103 = vmatmul.mubr.msk.f32.gmra.mrb[26].mxu0 %vm928_vm7, %v2128_v59  ;;  %3033 = vmatprep.mubr.msk.f32.mxu1 %vm928_vm7, %v4137_v31  ;;  %v1411_v29 = vpop.permute.xlu1 %1410 }
 0x190   : > { %1404 = vst.msk [vmem:[#allocation3 + $0xf7] sm:$0xff] %vm617_vm4, %v1352_v27  ;;  %2003 = vst.msk [vmem:[#allocation3 + $0xe7] sm:$0xff] %vm617_vm4, %v1352_v27 }
 0x191   : > { %1405 = vst.msk [vmem:[#allocation3 + $0xff] sm:$0x1] %vm619_vm1, %v1354_v55  ;;  %2004 = vst.msk [vmem:[#allocation3 + $0xef] sm:$0x1] %vm619_vm1, %v1354_v55  ;;  %v1952_v31 = vpop.permute.xlu0 %1951 }
 0x192   : > { %1460 = vst.msk [vmem:[#allocation3 + $0xee] sm:$0xfc] %vm810_vm3, %v1407_v56  ;;  %2059 = vst.msk [vmem:[#allocation3 + $0xde] sm:$0xfc] %vm810_vm3, %v1407_v56  ;;  %3034 = vmatmul.mubr.msk.f32.vlgmr.msra.gmra.mrb[16].mxu1 %vm928_vm7, %v4143_v9 }
 0x193   : > { %1461 = vst.msk [vmem:[#allocation3 + $0xf6] sm:$0xff] %vm812_vm6, %v1409_v26  ;;  %2060 = vst.msk [vmem:[#allocation3 + $0xe6] sm:$0xff] %vm812_vm6, %v1409_v26  ;;  %3036 = vmatprep.mubr.msk.f32.mxu1 %vm928_vm7, %v4175_v10  ;;  %v1954_v21 = vpop.permute.xlu1 %1953 }
 0x194   : > { %1462 = vst.msk [vmem:[#allocation3 + $0xfe] sm:$0x3] %vm814_vm5, %v1411_v29  ;;  %2061 = vst.msk [vmem:[#allocation3 + $0xee] sm:$0x3] %vm814_vm5, %v1411_v29 }
 0x195   : > { %v1956_v61 = vpop.permute.xlu0 %1955 }
 0x196   : > { %3037 = vmatmul.mubr.msk.f32.gmra.mrb[18].mxu1 %vm928_vm7, %v4181_v19 }
 0x197   : > { %3039 = vmatprep.mubr.msk.f32.mxu1 %vm928_vm7, %v4213_v20  ;;  %v2009_v34 = vpop.permute.xlu1 %2008  ;;  %v2957_v20 = vpop.f32.mrb[0].mxu1 }
 0x198   : > { %v1251_v7 = vadd.f32 %v2957_v20, %v4421_v6 }
 0x19a   : > { %v1529_v12 = vld [vmem:[#allocation3 + $0xf0] sm:$0xff]  ;;  %v2129_v35 = vld [vmem:[#allocation3 + $0xe0] sm:$0xff]  ;;  %3040 = vmatmul.mubr.msk.f32.gmra.mrb[20].mxu1 %vm928_vm7, %v4219_v13  ;;  %v1091_v13 = vpop.f32.mrb[1].mxu1 }
 0x19b   : > { %v1530_v60 = vld [vmem:[#allocation3 + $0xf8] sm:$0xff]  ;;  %1946 = vst.msk [vmem:[#allocation3 + $0xf0] sm:$0xff] %vm390_vm0, %v4026_v45  ;;  %3105 = vmatprep.mubr.msk.f32.mxu0 %vm928_vm7, %v2129_v35  ;;  %v2130_v9 = vld [vmem:[#allocation3 + $0xe8] sm:$0xff]  ;;  %3042 = vmatprep.mubr.msk.f32.mxu1 %vm928_vm7, %v4248_v3  ;;  %v2011_v45 = vpop.permute.xlu0 %2010  ;;  %v2960_v62 = vpop.f32.mrb[2].mxu1  ;;  %v1250_v30 = vadd.f32 %v4421_v6, %v1091_v13 }
 0x19c   : > { %1947 = vst.msk [vmem:[#allocation3 + $0xf8] sm:$0xff] %vm390_vm0, %v4029_v46  ;;  %3106 = vmatmul.mubr.msk.f32.gmra.mrb[28].mxu0 %vm928_vm7, %v2130_v9  ;;  %v2013_v46 = vpop.permute.xlu1 %2012  ;;  %v1101_v63 = vpop.f32.mrb[3].mxu1 }
 0x19d   : > { %2005 = vst.msk [vmem:[#allocation3 + $0xef] sm:$0xfe] %vm615_vm2, %v1952_v31  ;;  %v2963_v0 = vpop.f32.mrb[4].mxu1  ;;  %v1252_v16 = vadd.f32 %v4421_v6, %v1101_v63 }
 0x19e   : > { %2006 = vst.msk [vmem:[#allocation3 + $0xf7] sm:$0xff] %vm617_vm4, %v1954_v21  ;;  %3043 = vmatmul.mubr.msk.f32.gmra.mrb[22].mxu1 %vm928_vm7, %v4255_v14  ;;  %v1111_v1 = vpop.f32.mrb[5].mxu1  ;;  %v1255_v39 = vadd.f32 %v2963_v0, %v4421_v6 }
 0x19f   : > { %2007 = vst.msk [vmem:[#allocation3 + $0xff] sm:$0x1] %vm619_vm1, %v1956_v61  ;;  %3045 = vmatprep.mubr.msk.f32.mxu1 %vm928_vm7, %v4282_v33  ;;  %v1254_v42 = vadd.f32 %v4421_v6, %v1111_v1 }
 0x1a0   : > { %2062 = vst.msk [vmem:[#allocation3 + $0xee] sm:$0xfc] %vm810_vm3, %v2009_v34 }
 0x1a1   : > { %2063 = vst.msk [vmem:[#allocation3 + $0xf6] sm:$0xff] %vm812_vm6, %v2011_v45 }
 0x1a2   : > { %2064 = vst.msk [vmem:[#allocation3 + $0xfe] sm:$0x3] %vm814_vm5, %v2013_v46  ;;  %3046 = vmatmul.mubr.msk.f32.gmra.mrb[24].mxu1 %vm928_vm7, %v4289_v24  ;;  %v1253_v24 = vadd.f32 %v2960_v62, %v4421_v6 }
 0x1a3   : > { %3048 = vmatprep.mubr.msk.f32.mxu1 %vm928_vm7, %v4316_v49  ;;  %v2966_v23 = vpop.f32.mrb[6].mxu1 }
 0x1a4   : > { %v1121_v22 = vpop.f32.mrb[7].mxu1 }
 0x1a5   : > { %v1256_v18 = vadd.f32 %v4421_v6, %v1121_v22 }
 0x1a6   : > { %3049 = vmatmul.mubr.msk.f32.gmra.mrb[26].mxu1 %vm928_vm7, %v4323_v11  ;;  %v1257_v11 = vadd.f32 %v2966_v23, %v4421_v6 }
 0x1a7   : > { %3051 = vmatprep.mubr.msk.f32.mxu1 %vm928_vm7, %v4348_v53 }
 0x1a8   : > { %v2131_v10 = vld [vmem:[#allocation3 + $0xf0] sm:$0xff] }
 0x1a9   : > { %v2132_v19 = vld [vmem:[#allocation3 + $0xf8] sm:$0xff]  ;;  %3108 = vmatprep.mubr.msk.f32.mxu0 %vm928_vm7, %v2131_v10 }
 0x1aa   : > { %3109 = vmatmul.mubr.msk.f32.gmra.mrb[30].mxu0 %vm928_vm7, %v2132_v19  ;;  %3052 = vmatmul.mubr.msk.f32.gmra.mrb[28].mxu1 %vm928_vm7, %v1528_v58 }
 0x1ab   : > { %3054 = vmatprep.mubr.msk.f32.mxu1 %vm928_vm7, %v1529_v12 }
 0x1ae   : > { %3055 = vmatmul.mubr.msk.f32.gmra.mrb[30].mxu1 %vm928_vm7, %v1530_v60 }
 0x1b3   : > { %v2969_v2 = vpop.f32.mrb[8].mxu1 }
 0x1b4   : > { %v1131_v3 = vpop.f32.mrb[9].mxu1  ;;  %v1259_v27 = vadd.f32 %v2969_v2, %v4421_v6 }
 0x1b5   : > { %v1258_v52 = vadd.f32 %v4421_v6, %v1131_v3 }
 0x1c3   : > { %v2972_v4 = vpop.f32.mrb[10].mxu1 }
 0x1c4   : > { %v1141_v14 = vpop.f32.mrb[11].mxu1  ;;  %v1261_v57 = vadd.f32 %v2972_v4, %v4421_v6 }
 0x1c5   : > { %v1260_v58 = vadd.f32 %v4421_v6, %v1141_v14 }
 0x1d3   : > { %v2975_v15 = vpop.f32.mrb[12].mxu1 }
 0x1d4   : > { %v1151_v5 = vpop.f32.mrb[13].mxu1  ;;  %v1263_v21 = vadd.f32 %v2975_v15, %v4421_v6 }
 0x1d5   : > { %v1262_v12 = vadd.f32 %v4421_v6, %v1151_v5 }
 0x1e3   : > { %v2978_v37 = vpop.f32.mrb[14].mxu1 }
 0x1e4   : > { %v1161_v38 = vpop.f32.mrb[15].mxu1  ;;  %v1265_v9 = vadd.f32 %v2978_v37, %v4421_v6 }
 0x1e5   : > { %v1264_v45 = vadd.f32 %v4421_v6, %v1161_v38 }
 0x1f7   : > { %v3065_v32 = vpop.f32.mrb[0].mxu0 }
 0x1f8   : > { %v3128_v8 = vadd.f32 %v3065_v32, %v1251_v7  ;;  %v2295_v33 = vpop.f32.mrb[1].mxu0 }
 0x1f9   : > { %v3130_v25 = vadd.f32 %v2295_v33, %v1250_v30 }
 0x1fa   : > { %2551 = vst [vmem:[%s4428_s6 + $0x8] sm:$0xff] %v3128_v8 }
 0x1fb   : > { %2550 = vst [vmem:[%s4428_s6] sm:$0xff] %v3130_v25  ;;  %v3068_v17 = vpop.f32.mrb[2].mxu0 }
 0x1fc   : > { %v3132_v40 = vadd.f32 %v3068_v17, %v1253_v24  ;;  %v2305_v41 = vpop.f32.mrb[3].mxu0 }
 0x1fd   : > { %v3134_v36 = vadd.f32 %v2305_v41, %v1252_v16 }
 0x1fe   : > { %2553 = vst [vmem:[%s4428_s6 + $0x18] sm:$0xff] %v3132_v40 }
 0x1ff   : > { %2552 = vst [vmem:[%s4428_s6 + $0x10] sm:$0xff] %v3134_v36  ;;  %v3071_v47 = vpop.f32.mrb[4].mxu0 }
 0x200   : > { %v3136_v48 = vadd.f32 %v3071_v47, %v1255_v39  ;;  %v2315_v49 = vpop.f32.mrb[5].mxu0 }
 0x201   : > { %v3138_v50 = vadd.f32 %v2315_v49, %v1254_v42 }
 0x202   : > { %2555 = vst [vmem:[%s4428_s6 + $0x28] sm:$0xff] %v3136_v48 }
 0x203   : > { %2554 = vst [vmem:[%s4428_s6 + $0x20] sm:$0xff] %v3138_v50 }
 0x204   : > { %v3074_v51 = vpop.f32.mrb[6].mxu0 }
 0x205   : > { %v3140_v43 = vadd.f32 %v3074_v51, %v1257_v11  ;;  %v2325_v44 = vpop.f32.mrb[7].mxu0 }
 0x206   : > { %v3142_v28 = vadd.f32 %v2325_v44, %v1256_v18 }
 0x207   : > { %2557 = vst [vmem:[%s4428_s6 + $0x38] sm:$0xff] %v3140_v43 }
 0x208   : > { %2556 = vst [vmem:[%s4428_s6 + $0x30] sm:$0xff] %v3142_v28  ;;  %v3077_v53 = vpop.f32.mrb[8].mxu0 }
 0x209   : > { %v3144_v54 = vadd.f32 %v3077_v53, %v1259_v27  ;;  %v2335_v55 = vpop.f32.mrb[9].mxu0 }
 0x20a   : > { %v3146_v56 = vadd.f32 %v2335_v55, %v1258_v52 }
 0x20b   : > { %2559 = vst [vmem:[%s4428_s6 + $0x48] sm:$0xff] %v3144_v54 }
 0x20c   : > { %2558 = vst [vmem:[%s4428_s6 + $0x40] sm:$0xff] %v3146_v56  ;;  %v3080_v59 = vpop.f32.mrb[10].mxu0 }
 0x20d   : > { %v3148_v26 = vadd.f32 %v3080_v59, %v1261_v57  ;;  %v2345_v29 = vpop.f32.mrb[11].mxu0 }
 0x20e   : > { %v3150_v31 = vadd.f32 %v2345_v29, %v1260_v58 }
 0x20f   : > { %2561 = vst [vmem:[%s4428_s6 + $0x58] sm:$0xff] %v3148_v26 }
 0x210   : > { %2560 = vst [vmem:[%s4428_s6 + $0x50] sm:$0xff] %v3150_v31 }
 0x214   : > { %v3083_v60 = vpop.f32.mrb[12].mxu0 }
 0x215   : > { %v3152_v61 = vadd.f32 %v3083_v60, %v1263_v21  ;;  %v2355_v35 = vpop.f32.mrb[13].mxu0 }
 0x216   : > { %v3154_v34 = vadd.f32 %v2355_v35, %v1262_v12 }
 0x217   : > { %2563 = vst [vmem:[%s4428_s6 + $0x68] sm:$0xff] %v3152_v61 }
 0x218   : > { %2562 = vst [vmem:[%s4428_s6 + $0x60] sm:$0xff] %v3154_v34  ;;  %v3086_v46 = vpop.f32.mrb[14].mxu0 }
 0x219   : > { %v3156_v10 = vadd.f32 %v3086_v46, %v1265_v9  ;;  %v2365_v19 = vpop.f32.mrb[15].mxu0 }
 0x21a   : > { %v3158_v20 = vadd.f32 %v2365_v19, %v1264_v45 }
 0x21b   : > { %2565 = vst [vmem:[%s4428_s6 + $0x78] sm:$0xff] %v3156_v10 }
 0x21c   : > { %2564 = vst [vmem:[%s4428_s6 + $0x70] sm:$0xff] %v3158_v20  ;;  %v3089_v13 = vpop.f32.mrb[16].mxu0 }
 0x21d   : > { %v2375_v62 = vpop.f32.mrb[17].mxu0 }
 0x223   : > { %v3092_v63 = vpop.f32.mrb[18].mxu0 }
 0x224   : > { %v2385_v0 = vpop.f32.mrb[19].mxu0 }
 0x232   : > { %v3095_v1 = vpop.f32.mrb[20].mxu0 }
 0x233   : > { %v2395_v23 = vpop.f32.mrb[21].mxu0 }
 0x242   : > { %v3098_v22 = vpop.f32.mrb[22].mxu0 }
 0x243   : > { %v2405_v2 = vpop.f32.mrb[23].mxu0 }
 0x252   : > { %v3101_v3 = vpop.f32.mrb[24].mxu0 }
 0x253   : > { %v2415_v4 = vpop.f32.mrb[25].mxu0 }
 0x262   : > { %v3104_v14 = vpop.f32.mrb[26].mxu0 }
 0x263   : > { %v2425_v15 = vpop.f32.mrb[27].mxu0 }
 0x265   : > { %v3035_v5 = vpop.f32.mrb[16].mxu1 }
 0x266   : > { %v3159_v37 = vadd.f32 %v3035_v5, %v4421_v6  ;;  %v1773_v38 = vpop.f32.mrb[17].mxu1 }
 0x267   : > { %v3161_v7 = vadd.f32 %v4421_v6, %v1773_v38 }
 0x268   : > { %v3160_v30 = vadd.f32 %v3159_v37, %v3089_v13 }
 0x269   : > { %v3162_v32 = vadd.f32 %v3161_v7, %v2375_v62  ;;  %v3038_v8 = vpop.f32.mrb[18].mxu1 }
 0x26a   : > { %2567 = vst [vmem:[%s4428_s6 + $0x88] sm:$0xff] %v3160_v30  ;;  %v3163_v33 = vadd.f32 %v3038_v8, %v4421_v6  ;;  %v1783_v25 = vpop.f32.mrb[19].mxu1 }
 0x26b   : > { %2566 = vst [vmem:[%s4428_s6 + $0x80] sm:$0xff] %v3162_v32  ;;  %v3165_v24 = vadd.f32 %v4421_v6, %v1783_v25 }
 0x26c   : > { %v3164_v16 = vadd.f32 %v3163_v33, %v3092_v63 }
 0x26d   : > { %v3166_v17 = vadd.f32 %v3165_v24, %v2385_v0  ;;  %v3041_v40 = vpop.f32.mrb[20].mxu1 }
 0x26e   : > { %2569 = vst [vmem:[%s4428_s6 + $0x98] sm:$0xff] %v3164_v16  ;;  %v3167_v36 = vadd.f32 %v3041_v40, %v4421_v6  ;;  %v1793_v39 = vpop.f32.mrb[21].mxu1 }
 0x26f   : > { %v3107_v41 = vpop.f32.mrb[28].mxu0  ;;  %2568 = vst [vmem:[%s4428_s6 + $0x90] sm:$0xff] %v3166_v17  ;;  %v3169_v47 = vadd.f32 %v4421_v6, %v1793_v39 }
 0x270   : > { %v2435_v42 = vpop.f32.mrb[29].mxu0  ;;  %v3168_v48 = vadd.f32 %v3167_v36, %v3095_v1 }
 0x271   : > { %v3170_v49 = vadd.f32 %v3169_v47, %v2395_v23  ;;  %v3044_v50 = vpop.f32.mrb[22].mxu1 }
 0x272   : > { %2571 = vst [vmem:[%s4428_s6 + $0xa8] sm:$0xff] %v3168_v48  ;;  %v3171_v11 = vadd.f32 %v3044_v50, %v4421_v6  ;;  %v1803_v18 = vpop.f32.mrb[23].mxu1 }
 0x273   : > { %2570 = vst [vmem:[%s4428_s6 + $0xa0] sm:$0xff] %v3170_v49  ;;  %v3173_v51 = vadd.f32 %v4421_v6, %v1803_v18 }
 0x274   : > { %v3172_v43 = vadd.f32 %v3171_v11, %v3098_v22 }
 0x275   : > { %v3174_v44 = vadd.f32 %v3173_v51, %v2405_v2  ;;  %v3047_v28 = vpop.f32.mrb[24].mxu1 }
 0x276   : > { %2573 = vst [vmem:[%s4428_s6 + $0xb8] sm:$0xff] %v3172_v43  ;;  %v3175_v27 = vadd.f32 %v3047_v28, %v4421_v6  ;;  %v1813_v52 = vpop.f32.mrb[25].mxu1 }
 0x277   : > { %2572 = vst [vmem:[%s4428_s6 + $0xb0] sm:$0xff] %v3174_v44  ;;  %v3177_v53 = vadd.f32 %v4421_v6, %v1813_v52 }
 0x278   : > { %v3176_v54 = vadd.f32 %v3175_v27, %v3101_v3 }
 0x279   : > { %v3178_v55 = vadd.f32 %v3177_v53, %v2415_v4  ;;  %v3050_v56 = vpop.f32.mrb[26].mxu1 }
 0x27a   : > { %2575 = vst [vmem:[%s4428_s6 + $0xc8] sm:$0xff] %v3176_v54  ;;  %v3179_v58 = vadd.f32 %v3050_v56, %v4421_v6  ;;  %v1823_v59 = vpop.f32.mrb[27].mxu1 }
 0x27b   : > { %2574 = vst [vmem:[%s4428_s6 + $0xc0] sm:$0xff] %v3178_v55  ;;  %v3181_v29 = vadd.f32 %v4421_v6, %v1823_v59 }
 0x27c   : > { %v3180_v31 = vadd.f32 %v3179_v58, %v3104_v14 }
 0x27d   : > { %v3110_v57 = vpop.f32.mrb[30].mxu0  ;;  %v3182_v21 = vadd.f32 %v3181_v29, %v2425_v15  ;;  %v3053_v12 = vpop.f32.mrb[28].mxu1 }
 0x27e   : > { %v2445_v26 = vpop.f32.mrb[31].mxu0  ;;  %2577 = vst [vmem:[%s4428_s6 + $0xd8] sm:$0xff] %v3180_v31  ;;  %v3183_v60 = vadd.f32 %v3053_v12, %v4421_v6  ;;  %v1833_v61 = vpop.f32.mrb[29].mxu1 }
 0x27f   : > { %2576 = vst [vmem:[%s4428_s6 + $0xd0] sm:$0xff] %v3182_v21  ;;  %v3185_v35 = vadd.f32 %v4421_v6, %v1833_v61 }
 0x280   : > { %v3184_v34 = vadd.f32 %v3183_v60, %v3107_v41 }
 0x281   : > { %v3186_v9 = vadd.f32 %v3185_v35, %v2435_v42  ;;  %v3056_v45 = vpop.f32.mrb[30].mxu1 }
 0x282   : > { %2579 = vst [vmem:[%s4428_s6 + $0xe8] sm:$0xff] %v3184_v34  ;;  %v3187_v46 = vadd.f32 %v3056_v45, %v4421_v6  ;;  %v1843_v10 = vpop.f32.mrb[31].mxu1 }
 0x283   : > { %2578 = vst [vmem:[%s4428_s6 + $0xe0] sm:$0xff] %v3186_v9  ;;  %v3189_v19 = vadd.f32 %v4421_v6, %v1843_v10 }
 0x284   : > { %v3188_v20 = vadd.f32 %v3187_v46, %v3110_v57 }
 0x285   : > { %v3190_v13 = vadd.f32 %v3189_v19, %v2445_v26 }
 0x286   : > { %2581 = vst [vmem:[%s4428_s6 + $0xf8] sm:$0xff] %v3188_v20 }
 0x287   : > { %2580 = vst [vmem:[%s4428_s6 + $0xf0] sm:$0xff] %v3190_v13 }
 0x288   : > { %3296 = shalt.err (!%p3293_p5)
}
 0x289   : > { %s3297_s24 = scalar_lea.hbm %s4494_s14, 4096  ;;  %s3301_s30 = scalar_lea.hbm %s4553_s4, 8192 }
 0x28a   : > { %p3298_p6 = scmp.ne.s32.totalorder %s4494_s14, %s3297_s24  ;;  %p3302_p10 = scmp.lt.u32.totalorder %s4494_s14, %s4553_s4 }
 0x28b   : > { %p3303_p11 = scmp.lt.u32.totalorder %s3301_s30, %s3297_s24  ;;  %p3305_p13 = scmp.lt.u32.totalorder %s3297_s24, %s4494_s14 }
 0x28c   : > { %p3299_p7 = pnand %p3298_p6, %p3432_p4 }
 0x28d   : > { %p3304_p12 = por %p3303_p11, %p3302_p10 }
 0x28e   : > { %p3300_p9 = pneg %p3299_p7 }
 0x28f   : > { %p3306_p0 = por %p3305_p13, %p3304_p12 }
 0x291   : > { %p3307_p1 = pnand %p3306_p0, %p3300_p9 }
 0x293   : > { %3310 = shalt.err (!%p3307_p1)
}
 0x294   : > { %s3366_s7 = smov 128  }
 0x295   : > { %3225 = dma.vmem_to_hbm [thread:$0]  (%p3432_p4), %s4496_s8, 4096, %s4494_s14, %s4502_s18, %s3366_s7, %s3366_s7, %s3363_s12  }
 0x296 PF: > { %p3231_p2 = scmp.ge.s32.totalorder %s3361_s20, 2  ;;  %s2615_s9 = sand.u32 1, %s3341_s15  }
 0x297   : > { %s2616_s10 = scalar_lea.sflag [#allocation5], %s2615_s9 }
 0x298   : > { %p3228_p3 = pnand %p3231_p2, %p3439_p8 }
 0x29a   : > { %3336 = dma.done.wait (!%p3228_p3), %s2616_s10, 4096  }
 0x29b   : > { %3338 = vsyncadd (!%p3228_p3), %s2616_s10, 4294963200  ;;  %s17_s20 = sadd.s32 1, %s3361_s20   ;;  %s4556_s15 = smov %s3345_s16 }
 0x29c   : > { %p14_p5 = scmp.ge.s32.totalorder %s17_s20, 4   ;;  %s4557_s16 = smov %s3349_s17 }
 0x29d   : > { %s4558_s17 = smov %s3445_s28  ;;  %s4559_s18 = smov %s3357_s19 }
 0x29e   : > { %s4560_s19 = smov %s4562_s23  ;;  %16 = sbr.rel (!%p14_p5) target bundleno = 4 (0x4), region = 82 }
 0x2a5   :  { %2621 = vsyncpa [#allocation5], 1 }
 0x2a6   :  { %2623 = vsyncpa [#allocation5 + $0x1], 1 }

</bundles_post_ra>
